<compile_context>
chip_gen: v6e
topology: v6e:2x2x1
jax: 0.10.0
libtpu: 0.0.40
codegen_flags: <defaults>
</compile_context>

<pallas_src>
import functools
import math

import jax
import jax.numpy as jnp
from jax import lax
from jax.experimental import pallas as pl
from jax.experimental.pallas import tpu as pltpu

# MXU operand dtype (bf16 halves HBM/DMA bytes and maximizes MXU rate on
# v6e/v7x; accumulation stays f32).  Set to jnp.float32 for parity checks.
MXU_DTYPE = jnp.bfloat16


# ----------------------------------------------------------------------------
# Small in-kernel helpers (elementwise / LN / softmax, all f32 math)
# ----------------------------------------------------------------------------
def _erf_approx(x):
    # Abramowitz & Stegun 7.1.26 rational approximation (|err| <= 1.5e-7),
    # built only from elementwise ops with guaranteed Mosaic lowerings.
    a1, a2, a3, a4, a5 = 0.254829592, -0.284496736, 1.421413741, -1.453152027, 1.061405429
    p = 0.3275911
    s = jnp.where(x >= 0.0, 1.0, -1.0)
    z = jnp.abs(x)
    t = 1.0 / (1.0 + p * z)
    poly = ((((a5 * t + a4) * t + a3) * t + a2) * t + a1) * t
    return s * (1.0 - poly * jnp.exp(-z * z))


def _gelu(x):
    # torch nn.GELU default (erf based).
    return 0.5 * x * (1.0 + _erf_approx(x * (1.0 / math.sqrt(2.0))))


def _ln(x, g, b, eps):
    mu = jnp.mean(x, axis=-1, keepdims=True)
    var = jnp.mean(jnp.square(x - mu), axis=-1, keepdims=True)
    return (x - mu) * lax.rsqrt(var + eps) * g + b


def _softmax_last(s):
    s = s - jnp.max(s, axis=-1, keepdims=True)
    e = jnp.exp(s)
    return e * pl.reciprocal(jnp.sum(e, axis=-1, keepdims=True), approx=True)


def _tree_max(parts):
    # Pairwise-tree maximum over a list of equally shaped arrays.
    while len(parts) > 1:
        nxt = [jnp.maximum(parts[i], parts[i + 1]) for i in range(0, len(parts) - 1, 2)]
        if len(parts) % 2:
            nxt.append(parts[-1])
        parts = nxt
    return parts[0]


# ----------------------------------------------------------------------------
# The fused per-batch kernel: P4DConv convs + pooling + pos-embedding +
# transformer + memory bank + decode head.  One grid step == one batch elem.
# ----------------------------------------------------------------------------
def _mega_kernel(grp_ref, xyzts_ref, wcat_ref, wpos_ref, bpos_ref,
                 ln1g_ref, ln1b_ref, wqkv_ref, wout_ref, bout_ref,
                 ln2g_ref, ln2b_ref, wff1_ref, bff1_ref, wff2_ref, bff2_ref,
                 mem_ref, hlng_ref, hlnb_ref, wh1_ref, bh1_ref, wh2_ref, bh2_ref,
                 o_ref, *, G, N, depth, heads, dim_head, emb_relu, mem_scale, eps):
    inner = heads * dim_head

    # --- P4DConv 1x1 convs (conv_d + conv_f fused via concat weights) ---
    # One long matmul over all (tks*k) group frames, then tree-max over G.
    y = jnp.dot(grp_ref[...], wcat_ref[...],
                preferred_element_type=jnp.float32)                 # (G*N, dim)
    feat = _tree_max([y[g * N:(g + 1) * N] for g in range(G)])      # (N, dim)

    # --- pos_embedding (Conv1d(4, dim, 1)) + '+ features' + optional ReLU ---
    pos = jnp.dot(xyzts_ref[...], wpos_ref[...],
                  preferred_element_type=jnp.float32) + bpos_ref[...]
    x = pos + feat
    if emb_relu:
        x = jnp.maximum(x, 0.0)

    # --- transformer layers ---
    for l in range(depth):
        # PreNorm -> fused QKV matmul (scale already folded into Q columns).
        hn = _ln(x, ln1g_ref[l], ln1b_ref[l], eps).astype(MXU_DTYPE)
        qkv = jnp.dot(hn, wqkv_ref[l], preferred_element_type=jnp.float32)  # (N, 3*inner)
        heads_out = []
        for h in range(heads):
            q = qkv[:, h * dim_head:(h + 1) * dim_head]
            k = qkv[:, inner + h * dim_head:inner + (h + 1) * dim_head]
            v = qkv[:, 2 * inner + h * dim_head:2 * inner + (h + 1) * dim_head]
            s = lax.dot_general(q.astype(MXU_DTYPE), k.astype(MXU_DTYPE),
                                (((1,), (1,)), ((), ())),
                                preferred_element_type=jnp.float32)
            p = _softmax_last(s)
            heads_out.append(jnp.dot(p.astype(MXU_DTYPE), v.astype(MXU_DTYPE),
                                     preferred_element_type=jnp.float32))
        o = jnp.concatenate(heads_out, axis=-1)                     # (N, inner)
        x = x + jnp.dot(o.astype(MXU_DTYPE), wout_ref[l],
                        preferred_element_type=jnp.float32) + bout_ref[l]

        # PreNorm -> FF1 -> GELU -> FF2 -> residual.
        hn2 = _ln(x, ln2g_ref[l], ln2b_ref[l], eps).astype(MXU_DTYPE)
        a = jnp.dot(hn2, wff1_ref[l], preferred_element_type=jnp.float32) + bff1_ref[l]
        a = _gelu(a)
        x = x + jnp.dot(a.astype(MXU_DTYPE), wff2_ref[l],
                        preferred_element_type=jnp.float32) + bff2_ref[l]

    # --- AttentionMemoryBank (softmax over memory slots) ---
    logits = jnp.dot(x.astype(MXU_DTYPE), mem_ref[...],
                     preferred_element_type=jnp.float32) * mem_scale  # (N, M)
    p = _softmax_last(logits)
    x = lax.dot_general(p.astype(MXU_DTYPE), mem_ref[...],
                        (((1,), (1,)), ((), ())),
                        preferred_element_type=jnp.float32)           # (N, D)

    # --- decode: max over sequence -> LayerNorm -> Linear -> GELU -> Linear ---
    pooled = jnp.max(x, axis=0, keepdims=True)                        # (1, D)
    hn3 = _ln(pooled, hlng_ref[...], hlnb_ref[...], eps)
    a = jnp.dot(hn3.astype(MXU_DTYPE), wh1_ref[...],
                preferred_element_type=jnp.float32) + bh1_ref[...]
    a = _gelu(a)
    o_ref[...] = jnp.dot(a.astype(MXU_DTYPE), wh2_ref[...],
                         preferred_element_type=jnp.float32) + bh2_ref[...]


def fused_forward(grp, xyzts, wts, cfg):
    # grp: (B, G*N, C) bf16 group features; xyzts: (B, N, 4) f32 anchor coords+t.
    B, GN, C = grp.shape
    N = xyzts.shape[1]
    G = GN // N
    D = cfg["dim"]
    depth, heads, dh = cfg["depth"], cfg["heads"], cfg["dim_head"]
    inner = heads * dh
    F = cfg["mlp_dim"]
    M = wts["mem"].shape[1]
    OUT = wts["w_h2"].shape[1]

    kern = functools.partial(
        _mega_kernel, G=G, N=N, depth=depth, heads=heads, dim_head=dh,
        emb_relu=bool(cfg["emb_relu"]), mem_scale=1.0 / math.sqrt(D), eps=1e-5)

    def rep(*shape):
        # Grid-invariant block (weights): same block every grid step -> no re-DMA.
        return pl.BlockSpec(shape, lambda b, _n=len(shape): (0,) * _n)

    in_specs = [
        pl.BlockSpec((None, GN, C), lambda b: (b, 0, 0)),   # grouped points
        pl.BlockSpec((None, N, 4), lambda b: (b, 0, 0)),    # xyzts
        rep(C, D), rep(4, D), rep(1, D),                    # w_cat, w_pos, b_pos
        rep(depth, 1, D), rep(depth, 1, D),                 # ln1
        rep(depth, D, 3 * inner), rep(depth, inner, D), rep(depth, 1, D),  # qkv/out
        rep(depth, 1, D), rep(depth, 1, D),                 # ln2
        rep(depth, D, F), rep(depth, 1, F), rep(depth, F, D), rep(depth, 1, D),  # ff
        rep(D, M),                                          # memory bank
        rep(1, D), rep(1, D),                               # head LN
        rep(D, F), rep(1, F), rep(F, OUT), rep(1, OUT),     # mlp_head
    ]
    out = pl.pallas_call(
        kern,
        out_shape=jax.ShapeDtypeStruct((B, 1, OUT), jnp.float32),
        grid=(B,),
        in_specs=in_specs,
        out_specs=pl.BlockSpec((None, 1, OUT), lambda b: (b, 0, 0)),
        compiler_params=pltpu.CompilerParams(dimension_semantics=("parallel",)),
    )(grp.astype(MXU_DTYPE), xyzts.astype(jnp.float32),
      wts["w_cat"], wts["w_pos"], wts["b_pos"],
      wts["ln1_g"], wts["ln1_b"], wts["w_qkv"], wts["w_out"], wts["b_out"],
      wts["ln2_g"], wts["ln2_b"], wts["w_ff1"], wts["b_ff1"], wts["w_ff2"], wts["b_ff2"],
      wts["mem"], wts["head_ln_g"], wts["head_ln_b"],
      wts["w_h1"], wts["b_h1"], wts["w_h2"], wts["b_h2"])
    return out


# ----------------------------------------------------------------------------
# Host-side weight packing (stacks per-layer weights, folds attn scale into Q)
# ----------------------------------------------------------------------------
def pack_weights(params, cfg):
    D = cfg["dim"]
    inner = cfg["heads"] * cfg["dim_head"]
    scale = cfg["dim_head"] ** -0.5
    layers = params["layers"]

    def st(k):
        return jnp.stack([l[k] for l in layers])

    wqkv = st("w_qkv")                                            # (depth, D, 3*inner)
    wqkv = jnp.concatenate([wqkv[:, :, :inner] * scale, wqkv[:, :, inner:]], axis=-1)
    return dict(
        w_cat=jnp.concatenate([params["w_d"], params["w_f"]], axis=0).astype(MXU_DTYPE),
        w_pos=params["w_pos"].astype(jnp.float32),
        b_pos=params["b_pos"].reshape(1, D).astype(jnp.float32),
        ln1_g=st("ln1_g")[:, None, :], ln1_b=st("ln1_b")[:, None, :],
        w_qkv=wqkv.astype(MXU_DTYPE),
        w_out=st("w_out").astype(MXU_DTYPE),
        b_out=st("b_out")[:, None, :],
        ln2_g=st("ln2_g")[:, None, :], ln2_b=st("ln2_b")[:, None, :],
        w_ff1=st("w_ff1").astype(MXU_DTYPE), b_ff1=st("b_ff1")[:, None, :],
        w_ff2=st("w_ff2").astype(MXU_DTYPE), b_ff2=st("b_ff2")[:, None, :],
        mem=params["mem"].astype(MXU_DTYPE),
        head_ln_g=params["head_ln_g"].reshape(1, D),
        head_ln_b=params["head_ln_b"].reshape(1, D),
        w_h1=params["w_h1"].astype(MXU_DTYPE), b_h1=params["b_h1"].reshape(1, -1),
        w_h2=params["w_h2"].astype(MXU_DTYPE), b_h2=params["b_h2"].reshape(1, -1),
    )


# ----------------------------------------------------------------------------
# P4DConv grouping glue (data-dependent gathers kept as plain JAX)
# TODO(synk): FPS / ball-query / grouping are data-dependent gathers; they stay
# in plain JAX (a PrefetchScalarGridSpec + pl.Element gather kernel would be
# needed for very large N).
# ----------------------------------------------------------------------------
def farthest_point_sample(xyz, npoint):
    # xyz: [B, N, 3] -> [B, npoint] int32, seeded at index 0 (pointnet2 FPS).
    def one(pts):
        N = pts.shape[0]

        def step(carry, _):
            dist, last = carry
            d = jnp.sum(jnp.square(pts - pts[last]), axis=-1)
            dist = jnp.minimum(dist, d)
            nxt = jnp.argmax(dist).astype(jnp.int32)
            return (dist, nxt), last

        init = (jnp.full((N,), 1e10, jnp.float32), jnp.int32(0))
        _, idxs = lax.scan(step, init, None, length=npoint)
        return idxs

    return jax.vmap(one)(xyz)


def ball_query(radius, k, neighbor_xyz, anchor_xyz):
    # Vectorized ball query: neighbor_xyz [B,N,3], anchor_xyz [B,S,3] -> [B,S,k].
    N = neighbor_xyz.shape[1]
    d2 = jnp.sum(jnp.square(anchor_xyz[:, :, None, :] -
                            neighbor_xyz[:, None, :, :]), axis=-1)   # [B,S,N]
    valid = d2 < (radius * radius)
    key = jnp.where(valid, jnp.arange(N, dtype=jnp.int32)[None, None, :],
                    jnp.int32(N))
    order = jnp.sort(key, axis=-1)[..., :k]                          # first k valid idx
    num_valid = jnp.sum(valid.astype(jnp.int32), axis=-1, keepdims=True)
    first = jnp.where(num_valid > 0, order[..., :1], 0)              # replicate first valid
    slot = jnp.arange(k, dtype=jnp.int32)[None, None, :]
    return jnp.where(slot < num_valid, order, first).astype(jnp.int32)


def _group(points, idx):
    # points [B, N, C], idx [B, S, k] -> [B, S, k, C]
    return jax.vmap(lambda p, i: p[i])(points, idx)


def p4d_prepare(xyz, feat, cfg):
    # xyz: [B, L, N, 3]; feat: [B, L, Cin, N]  (as passed by Model.encode)
    B, L, N, _ = xyz.shape
    r, k = cfg["radius"], cfg["nsamples"]
    tks, tstride = cfg["temporal_kernel_size"], cfg["temporal_stride"]
    pad0, pad1 = cfg["temporal_padding"]
    tr = (tks - 1) // 2
    assert tks % 2 == 1
    assert (L + pad0 + pad1 - tks) % tstride == 0
    S = N // cfg["spatial_stride"]
    Cin = feat.shape[2]

    xyz_list = [xyz[:, 0]] * pad0 + [xyz[:, t] for t in range(L)] + [xyz[:, -1]] * pad1
    feat_list = [feat[:, 0]] * pad0 + [feat[:, t] for t in range(L)] + [feat[:, -1]] * pad1
    feat_list = [jnp.transpose(f, (0, 2, 1)) for f in feat_list]       # [B, N, Cin]

    anchors, groups = [], []
    for t in range(tr, len(xyz_list) - tr, tstride):
        anchor_idx = farthest_point_sample(xyz_list[t], S)             # [B, S]
        anchor_xyz = jax.vmap(lambda p, i: p[i])(xyz_list[t], anchor_idx)
        anchors.append(anchor_xyz)
        win = []
        for i in range(t - tr, t + tr + 1):
            idx = ball_query(r, k, xyz_list[i], anchor_xyz)             # [B, S, k]
            g_xyz = _group(xyz_list[i], idx)                            # [B, S, k, 3]
            disp = g_xyz - anchor_xyz[:, :, None, :]
            t_disp = jnp.full((B, S, k, 1), float(i - t), jnp.float32)
            g_feat = _group(feat_list[i], idx)                          # [B, S, k, Cin]
            win.append(jnp.concatenate([disp, t_disp, g_feat], axis=-1))
        groups.append(jnp.stack(win, axis=0))                           # [tks, B, S, k, C]

    T_out = len(anchors)
    C = 4 + Cin
    grp = jnp.stack(groups, axis=0)                                     # [T_out,tks,B,S,k,C]
    # Rows ordered (g = tks*k group index, n = t*S + s) per batch so the kernel
    # max-reduces the leading group axis with static slices.
    grp = jnp.transpose(grp, (2, 1, 4, 0, 3, 5)).reshape(B, tks * k * T_out * S, C)
    new_xyzs = jnp.stack(anchors, axis=1)                               # [B, T_out, S, 3]
    return grp, new_xyzs, T_out, S


# ----------------------------------------------------------------------------
# Model forward
# ----------------------------------------------------------------------------
def model_forward(params, inp, cfg):
    B = inp.shape[0]
    xyz = inp[..., :3]
    feat = jnp.transpose(xyz, (0, 1, 3, 2))          # input[:,:,:,:3].permute(0,1,3,2)
    grp, anchors, T_out, S = p4d_prepare(xyz, feat, cfg)
    Nrow = T_out * S

    tcol = jnp.broadcast_to((jnp.arange(T_out, dtype=jnp.float32) + 1.0)[None, :, None, None],
                            (B, T_out, S, 1))
    xyzts = jnp.concatenate([anchors, tcol], axis=-1).reshape(B, Nrow, 4)

    wts = pack_weights(params, cfg)
    out = fused_forward(grp, xyzts, wts, cfg)        # (B, 1, num_joints*3)
    return out.reshape(B, 1, cfg["num_joints"], 3)


def init_params(key, cfg):
    dim, mlp_dim = cfg["dim"], cfg["mlp_dim"]
    heads, dim_head = cfg["heads"], cfg["dim_head"]
    inner = heads * dim_head
    keys = iter(jax.random.split(key, 64))

    def nrm(shape, std=0.02):
        return std * jax.random.normal(next(keys), shape, jnp.float32)

    params = {
        "w_d": nrm((4, dim)),                     # P4DConv conv_d (bias=False)
        "w_f": nrm((cfg["features"], dim)),       # P4DConv conv_f (bias=False)
        "w_pos": nrm((4, dim)),
        "b_pos": nrm((dim,)),
        "mem": jax.random.normal(next(keys), (dim, cfg["mem_size"]), jnp.float32),
        "head_ln_g": jnp.ones((dim,), jnp.float32),
        "head_ln_b": jnp.zeros((dim,), jnp.float32),
        "w_h1": nrm((dim, mlp_dim)), "b_h1": nrm((mlp_dim,)),
        "w_h2": nrm((mlp_dim, cfg["num_joints"] * 3)), "b_h2": nrm((cfg["num_joints"] * 3,)),
        "layers": [],
    }
    for _ in range(cfg["depth"]):
        params["layers"].append({
            "ln1_g": jnp.ones((dim,), jnp.float32), "ln1_b": jnp.zeros((dim,), jnp.float32),
            "w_qkv": nrm((dim, 3 * inner)),
            "w_out": nrm((inner, dim)), "b_out": nrm((dim,)),
            "ln2_g": jnp.ones((dim,), jnp.float32), "ln2_b": jnp.zeros((dim,), jnp.float32),
            "w_ff1": nrm((dim, mlp_dim)), "b_ff1": nrm((mlp_dim,)),
            "w_ff2": nrm((mlp_dim, dim)), "b_ff2": nrm((dim,)),
        })
    return params


if __name__ == "__main__":
    cfg = dict(
        radius=0.7, nsamples=8, spatial_stride=4,
        temporal_kernel_size=3, temporal_stride=2, temporal_padding=(1, 1),
        emb_relu=True, dim=32, depth=2, heads=2, dim_head=16,
        mlp_dim=64, num_joints=13, features=3, mem_size=64,
    )
    key = jax.random.PRNGKey(0)
    pkey, xkey = jax.random.split(key)
    params = init_params(pkey, cfg)

    B, L, N = 2, 3, 32                       # batch, frames, points per frame
    inp = jax.random.uniform(xkey, (B, L, N, 3), jnp.float32)

    fwd = jax.jit(functools.partial(model_forward, cfg=cfg))
    out = jax.block_until_ready(fwd(params, inp))
    assert out.shape == (B, 1, cfg["num_joints"], 3)
    print("KERNEL_OK")
</pallas_src>

<mosaic_0001>
module attributes {stable_mosaic.version = 11 : i64} {
  func.func @_mega_kernel(%arg0: i32, %arg1: memref<1x384x7xbf16, #tpu.memory_space<vmem>>, %arg2: memref<1x16x4xf32, #tpu.memory_space<vmem>>, %arg3: memref<7x32xbf16, #tpu.memory_space<vmem>>, %arg4: memref<4x32xf32, #tpu.memory_space<vmem>>, %arg5: memref<1x32xf32, #tpu.memory_space<vmem>>, %arg6: memref<2x1x32xf32, #tpu.memory_space<vmem>>, %arg7: memref<2x1x32xf32, #tpu.memory_space<vmem>>, %arg8: memref<2x32x96xbf16, #tpu.memory_space<vmem>>, %arg9: memref<2x32x32xbf16, #tpu.memory_space<vmem>>, %arg10: memref<2x1x32xf32, #tpu.memory_space<vmem>>, %arg11: memref<2x1x32xf32, #tpu.memory_space<vmem>>, %arg12: memref<2x1x32xf32, #tpu.memory_space<vmem>>, %arg13: memref<2x32x64xbf16, #tpu.memory_space<vmem>>, %arg14: memref<2x1x64xf32, #tpu.memory_space<vmem>>, %arg15: memref<2x64x32xbf16, #tpu.memory_space<vmem>>, %arg16: memref<2x1x32xf32, #tpu.memory_space<vmem>>, %arg17: memref<32x64xbf16, #tpu.memory_space<vmem>>, %arg18: memref<1x32xf32, #tpu.memory_space<vmem>>, %arg19: memref<1x32xf32, #tpu.memory_space<vmem>>, %arg20: memref<32x64xbf16, #tpu.memory_space<vmem>>, %arg21: memref<1x64xf32, #tpu.memory_space<vmem>>, %arg22: memref<64x39xbf16, #tpu.memory_space<vmem>>, %arg23: memref<1x39xf32, #tpu.memory_space<vmem>>, %arg24: memref<1x1x39xf32, #tpu.memory_space<vmem>>) attributes {dimension_semantics = [#tpu.dimension_semantics<parallel>], iteration_bounds = array<i64: 2>, scalar_prefetch = 0 : i64, scratch_operands = 0 : i64, tpu.core_type = #tpu.core_type<tc>, window_params = [{transform_indices = @transform_0, window_bounds = array<i64: 1, 384, 7>}, {transform_indices = @transform_1, window_bounds = array<i64: 1, 16, 4>}, {pipeline_mode = #tpu.pipeline_mode<synchronous>, transform_indices = @transform_2, window_bounds = array<i64: 7, 32>}, {pipeline_mode = #tpu.pipeline_mode<synchronous>, transform_indices = @transform_3, window_bounds = array<i64: 4, 32>}, {pipeline_mode = #tpu.pipeline_mode<synchronous>, transform_indices = @transform_4, window_bounds = array<i64: 1, 32>}, {pipeline_mode = #tpu.pipeline_mode<synchronous>, transform_indices = @transform_5, window_bounds = array<i64: 2, 1, 32>}, {pipeline_mode = #tpu.pipeline_mode<synchronous>, transform_indices = @transform_6, window_bounds = array<i64: 2, 1, 32>}, {pipeline_mode = #tpu.pipeline_mode<synchronous>, transform_indices = @transform_7, window_bounds = array<i64: 2, 32, 96>}, {pipeline_mode = #tpu.pipeline_mode<synchronous>, transform_indices = @transform_8, window_bounds = array<i64: 2, 32, 32>}, {pipeline_mode = #tpu.pipeline_mode<synchronous>, transform_indices = @transform_9, window_bounds = array<i64: 2, 1, 32>}, {pipeline_mode = #tpu.pipeline_mode<synchronous>, transform_indices = @transform_10, window_bounds = array<i64: 2, 1, 32>}, {pipeline_mode = #tpu.pipeline_mode<synchronous>, transform_indices = @transform_11, window_bounds = array<i64: 2, 1, 32>}, {pipeline_mode = #tpu.pipeline_mode<synchronous>, transform_indices = @transform_12, window_bounds = array<i64: 2, 32, 64>}, {pipeline_mode = #tpu.pipeline_mode<synchronous>, transform_indices = @transform_13, window_bounds = array<i64: 2, 1, 64>}, {pipeline_mode = #tpu.pipeline_mode<synchronous>, transform_indices = @transform_14, window_bounds = array<i64: 2, 64, 32>}, {pipeline_mode = #tpu.pipeline_mode<synchronous>, transform_indices = @transform_15, window_bounds = array<i64: 2, 1, 32>}, {pipeline_mode = #tpu.pipeline_mode<synchronous>, transform_indices = @transform_16, window_bounds = array<i64: 32, 64>}, {pipeline_mode = #tpu.pipeline_mode<synchronous>, transform_indices = @transform_17, window_bounds = array<i64: 1, 32>}, {pipeline_mode = #tpu.pipeline_mode<synchronous>, transform_indices = @transform_18, window_bounds = array<i64: 1, 32>}, {pipeline_mode = #tpu.pipeline_mode<synchronous>, transform_indices = @transform_19, window_bounds = array<i64: 32, 64>}, {pipeline_mode = #tpu.pipeline_mode<synchronous>, transform_indices = @transform_20, window_bounds = array<i64: 1, 64>}, {pipeline_mode = #tpu.pipeline_mode<synchronous>, transform_indices = @transform_21, window_bounds = array<i64: 64, 39>}, {pipeline_mode = #tpu.pipeline_mode<synchronous>, transform_indices = @transform_22, window_bounds = array<i64: 1, 39>}, {transform_indices = @transform_23, window_bounds = array<i64: 1, 1, 39>}]} {
    %c0 = arith.constant 0 : index
    %c0_0 = arith.constant 0 : index
    %c0_1 = arith.constant 0 : index
    %0 = vector.load %arg1[%c0, %c0_0, %c0_1] : memref<1x384x7xbf16, #tpu.memory_space<vmem>>, vector<1x384x7xbf16>
    %1 = vector.shape_cast %0 : vector<1x384x7xbf16> to vector<384x7xbf16>
    %c0_2 = arith.constant 0 : index
    %c0_3 = arith.constant 0 : index
    %2 = vector.load %arg3[%c0_2, %c0_3] : memref<7x32xbf16, #tpu.memory_space<vmem>>, vector<7x32xbf16>
    %cst = arith.constant dense<0.000000e+00> : vector<384x32xf32>
    %3 = tpu.matmul %1, %2, %cst {dimension_numbers = #tpu.dot_dimension_numbers<[1], [0], [0], [1], [0, 0, 1, 1], [], []>} : vector<384x7xbf16>, vector<7x32xbf16>, vector<384x32xf32> -> vector<384x32xf32>
    %4 = vector.extract_strided_slice %3 {offsets = [0, 0], sizes = [16, 32], strides = [1, 1]} : vector<384x32xf32> to vector<16x32xf32>
    %5 = vector.extract_strided_slice %3 {offsets = [16, 0], sizes = [16, 32], strides = [1, 1]} : vector<384x32xf32> to vector<16x32xf32>
    %6 = vector.extract_strided_slice %3 {offsets = [32, 0], sizes = [16, 32], strides = [1, 1]} : vector<384x32xf32> to vector<16x32xf32>
    %7 = vector.extract_strided_slice %3 {offsets = [48, 0], sizes = [16, 32], strides = [1, 1]} : vector<384x32xf32> to vector<16x32xf32>
    %8 = vector.extract_strided_slice %3 {offsets = [64, 0], sizes = [16, 32], strides = [1, 1]} : vector<384x32xf32> to vector<16x32xf32>
    %9 = vector.extract_strided_slice %3 {offsets = [80, 0], sizes = [16, 32], strides = [1, 1]} : vector<384x32xf32> to vector<16x32xf32>
    %10 = vector.extract_strided_slice %3 {offsets = [96, 0], sizes = [16, 32], strides = [1, 1]} : vector<384x32xf32> to vector<16x32xf32>
    %11 = vector.extract_strided_slice %3 {offsets = [112, 0], sizes = [16, 32], strides = [1, 1]} : vector<384x32xf32> to vector<16x32xf32>
    %12 = vector.extract_strided_slice %3 {offsets = [128, 0], sizes = [16, 32], strides = [1, 1]} : vector<384x32xf32> to vector<16x32xf32>
    %13 = vector.extract_strided_slice %3 {offsets = [144, 0], sizes = [16, 32], strides = [1, 1]} : vector<384x32xf32> to vector<16x32xf32>
    %14 = vector.extract_strided_slice %3 {offsets = [160, 0], sizes = [16, 32], strides = [1, 1]} : vector<384x32xf32> to vector<16x32xf32>
    %15 = vector.extract_strided_slice %3 {offsets = [176, 0], sizes = [16, 32], strides = [1, 1]} : vector<384x32xf32> to vector<16x32xf32>
    %16 = vector.extract_strided_slice %3 {offsets = [192, 0], sizes = [16, 32], strides = [1, 1]} : vector<384x32xf32> to vector<16x32xf32>
    %17 = vector.extract_strided_slice %3 {offsets = [208, 0], sizes = [16, 32], strides = [1, 1]} : vector<384x32xf32> to vector<16x32xf32>
    %18 = vector.extract_strided_slice %3 {offsets = [224, 0], sizes = [16, 32], strides = [1, 1]} : vector<384x32xf32> to vector<16x32xf32>
    %19 = vector.extract_strided_slice %3 {offsets = [240, 0], sizes = [16, 32], strides = [1, 1]} : vector<384x32xf32> to vector<16x32xf32>
    %20 = vector.extract_strided_slice %3 {offsets = [256, 0], sizes = [16, 32], strides = [1, 1]} : vector<384x32xf32> to vector<16x32xf32>
    %21 = vector.extract_strided_slice %3 {offsets = [272, 0], sizes = [16, 32], strides = [1, 1]} : vector<384x32xf32> to vector<16x32xf32>
    %22 = vector.extract_strided_slice %3 {offsets = [288, 0], sizes = [16, 32], strides = [1, 1]} : vector<384x32xf32> to vector<16x32xf32>
    %23 = vector.extract_strided_slice %3 {offsets = [304, 0], sizes = [16, 32], strides = [1, 1]} : vector<384x32xf32> to vector<16x32xf32>
    %24 = vector.extract_strided_slice %3 {offsets = [320, 0], sizes = [16, 32], strides = [1, 1]} : vector<384x32xf32> to vector<16x32xf32>
    %25 = vector.extract_strided_slice %3 {offsets = [336, 0], sizes = [16, 32], strides = [1, 1]} : vector<384x32xf32> to vector<16x32xf32>
    %26 = vector.extract_strided_slice %3 {offsets = [352, 0], sizes = [16, 32], strides = [1, 1]} : vector<384x32xf32> to vector<16x32xf32>
    %27 = vector.extract_strided_slice %3 {offsets = [368, 0], sizes = [16, 32], strides = [1, 1]} : vector<384x32xf32> to vector<16x32xf32>
    %28 = arith.maximumf %4, %5 : vector<16x32xf32>
    %29 = arith.maximumf %6, %7 : vector<16x32xf32>
    %30 = arith.maximumf %8, %9 : vector<16x32xf32>
    %31 = arith.maximumf %10, %11 : vector<16x32xf32>
    %32 = arith.maximumf %12, %13 : vector<16x32xf32>
    %33 = arith.maximumf %14, %15 : vector<16x32xf32>
    %34 = arith.maximumf %16, %17 : vector<16x32xf32>
    %35 = arith.maximumf %18, %19 : vector<16x32xf32>
    %36 = arith.maximumf %20, %21 : vector<16x32xf32>
    %37 = arith.maximumf %22, %23 : vector<16x32xf32>
    %38 = arith.maximumf %24, %25 : vector<16x32xf32>
    %39 = arith.maximumf %26, %27 : vector<16x32xf32>
    %40 = arith.maximumf %28, %29 : vector<16x32xf32>
    %41 = arith.maximumf %30, %31 : vector<16x32xf32>
    %42 = arith.maximumf %32, %33 : vector<16x32xf32>
    %43 = arith.maximumf %34, %35 : vector<16x32xf32>
    %44 = arith.maximumf %36, %37 : vector<16x32xf32>
    %45 = arith.maximumf %38, %39 : vector<16x32xf32>
    %46 = arith.maximumf %40, %41 : vector<16x32xf32>
    %47 = arith.maximumf %42, %43 : vector<16x32xf32>
    %48 = arith.maximumf %44, %45 : vector<16x32xf32>
    %49 = arith.maximumf %46, %47 : vector<16x32xf32>
    %50 = arith.maximumf %49, %48 : vector<16x32xf32>
    %c0_4 = arith.constant 0 : index
    %c0_5 = arith.constant 0 : index
    %c0_6 = arith.constant 0 : index
    %51 = vector.load %arg2[%c0_4, %c0_5, %c0_6] : memref<1x16x4xf32, #tpu.memory_space<vmem>>, vector<1x16x4xf32>
    %52 = vector.shape_cast %51 : vector<1x16x4xf32> to vector<16x4xf32>
    %c0_7 = arith.constant 0 : index
    %c0_8 = arith.constant 0 : index
    %53 = vector.load %arg4[%c0_7, %c0_8] : memref<4x32xf32, #tpu.memory_space<vmem>>, vector<4x32xf32>
    %cst_9 = arith.constant dense<0.000000e+00> : vector<16x32xf32>
    %54 = tpu.matmul %52, %53, %cst_9 {dimension_numbers = #tpu.dot_dimension_numbers<[1], [0], [0], [1], [0, 0, 1, 1], [], []>} : vector<16x4xf32>, vector<4x32xf32>, vector<16x32xf32> -> vector<16x32xf32>
    %c0_10 = arith.constant 0 : index
    %c0_11 = arith.constant 0 : index
    %55 = vector.load %arg5[%c0_10, %c0_11] : memref<1x32xf32, #tpu.memory_space<vmem>>, vector<1x32xf32>
    %56 = vector.broadcast %55 : vector<1x32xf32> to vector<16x32xf32>
    %57 = arith.addf %54, %56 : vector<16x32xf32>
    %58 = arith.addf %57, %50 : vector<16x32xf32>
    %cst_12 = arith.constant 0.000000e+00 : f32
    %59 = vector.broadcast %cst_12 : f32 to vector<16x32xf32>
    %60 = arith.maximumf %58, %59 : vector<16x32xf32>
    %c0_13 = arith.constant 0 : index
    %c0_14 = arith.constant 0 : index
    %c0_15 = arith.constant 0 : index
    %61 = vector.load %arg6[%c0_13, %c0_14, %c0_15] : memref<2x1x32xf32, #tpu.memory_space<vmem>>, vector<1x1x32xf32>
    %62 = vector.shape_cast %61 : vector<1x1x32xf32> to vector<1x32xf32>
    %c0_16 = arith.constant 0 : index
    %c0_17 = arith.constant 0 : index
    %c0_18 = arith.constant 0 : index
    %63 = vector.load %arg7[%c0_16, %c0_17, %c0_18] : memref<2x1x32xf32, #tpu.memory_space<vmem>>, vector<1x1x32xf32>
    %64 = vector.shape_cast %63 : vector<1x1x32xf32> to vector<1x32xf32>
    %cst_19 = arith.constant dense<0.000000e+00> : vector<16xf32>
    %65 = vector.multi_reduction <add>, %60, %cst_19 [1] : vector<16x32xf32> to vector<16xf32>
    %66 = vector.shape_cast %65 : vector<16xf32> to vector<16x1xf32>
    %cst_20 = arith.constant 3.200000e+01 : f32
    %67 = vector.broadcast %cst_20 : f32 to vector<16x1xf32>
    %68 = arith.divf %66, %67 : vector<16x1xf32>
    %69 = vector.broadcast %68 : vector<16x1xf32> to vector<16x32xf32>
    %70 = arith.subf %60, %69 : vector<16x32xf32>
    %71 = arith.mulf %70, %70 : vector<16x32xf32>
    %cst_21 = arith.constant dense<0.000000e+00> : vector<16xf32>
    %72 = vector.multi_reduction <add>, %71, %cst_21 [1] : vector<16x32xf32> to vector<16xf32>
    %73 = vector.shape_cast %72 : vector<16xf32> to vector<16x1xf32>
    %cst_22 = arith.constant 3.200000e+01 : f32
    %74 = vector.broadcast %cst_22 : f32 to vector<16x1xf32>
    %75 = arith.divf %73, %74 : vector<16x1xf32>
    %76 = vector.broadcast %68 : vector<16x1xf32> to vector<16x32xf32>
    %77 = arith.subf %60, %76 : vector<16x32xf32>
    %cst_23 = arith.constant 9.99999974E-6 : f32
    %78 = vector.broadcast %cst_23 : f32 to vector<16x1xf32>
    %79 = arith.addf %75, %78 : vector<16x1xf32>
    %80 = math.rsqrt %79 : vector<16x1xf32>
    %81 = vector.broadcast %80 : vector<16x1xf32> to vector<16x32xf32>
    %82 = arith.mulf %77, %81 : vector<16x32xf32>
    %83 = vector.broadcast %62 : vector<1x32xf32> to vector<16x32xf32>
    %84 = arith.mulf %82, %83 : vector<16x32xf32>
    %85 = vector.broadcast %64 : vector<1x32xf32> to vector<16x32xf32>
    %86 = arith.addf %84, %85 : vector<16x32xf32>
    %87 = arith.truncf %86 : vector<16x32xf32> to vector<16x32xbf16>
    %c0_24 = arith.constant 0 : index
    %c0_25 = arith.constant 0 : index
    %c0_26 = arith.constant 0 : index
    %88 = vector.load %arg8[%c0_24, %c0_25, %c0_26] : memref<2x32x96xbf16, #tpu.memory_space<vmem>>, vector<1x32x96xbf16>
    %89 = vector.shape_cast %88 : vector<1x32x96xbf16> to vector<32x96xbf16>
    %cst_27 = arith.constant dense<0.000000e+00> : vector<16x96xf32>
    %90 = tpu.matmul %87, %89, %cst_27 {dimension_numbers = #tpu.dot_dimension_numbers<[1], [0], [0], [1], [0, 0, 1, 1], [], []>} : vector<16x32xbf16>, vector<32x96xbf16>, vector<16x96xf32> -> vector<16x96xf32>
    %91 = vector.extract_strided_slice %90 {offsets = [0, 0], sizes = [16, 16], strides = [1, 1]} : vector<16x96xf32> to vector<16x16xf32>
    %92 = vector.extract_strided_slice %90 {offsets = [0, 32], sizes = [16, 16], strides = [1, 1]} : vector<16x96xf32> to vector<16x16xf32>
    %93 = vector.extract_strided_slice %90 {offsets = [0, 64], sizes = [16, 16], strides = [1, 1]} : vector<16x96xf32> to vector<16x16xf32>
    %94 = arith.truncf %91 : vector<16x16xf32> to vector<16x16xbf16>
    %95 = arith.truncf %92 : vector<16x16xf32> to vector<16x16xbf16>
    %cst_28 = arith.constant dense<0.000000e+00> : vector<16x16xf32>
    %96 = tpu.matmul %94, %95, %cst_28 {dimension_numbers = #tpu.dot_dimension_numbers<[1], [1], [0], [0], [0, 0, 1, 0], [], []>} : vector<16x16xbf16>, vector<16x16xbf16>, vector<16x16xf32> -> vector<16x16xf32>
    %cst_29 = arith.constant dense<0xFF800000> : vector<16xf32>
    %97 = vector.multi_reduction <maximumf>, %96, %cst_29 [1] : vector<16x16xf32> to vector<16xf32>
    %98 = vector.shape_cast %97 : vector<16xf32> to vector<16x1xf32>
    %99 = vector.broadcast %98 : vector<16x1xf32> to vector<16x16xf32>
    %100 = arith.subf %96, %99 : vector<16x16xf32>
    %101 = math.exp %100 : vector<16x16xf32>
    %cst_30 = arith.constant dense<0.000000e+00> : vector<16xf32>
    %102 = vector.multi_reduction <add>, %101, %cst_30 [1] : vector<16x16xf32> to vector<16xf32>
    %103 = vector.shape_cast %102 : vector<16xf32> to vector<16x1xf32>
    %104 = tpu.reciprocal %103 {approx = true} : vector<16x1xf32> -> vector<16x1xf32>
    %105 = vector.broadcast %104 : vector<16x1xf32> to vector<16x16xf32>
    %106 = arith.mulf %101, %105 : vector<16x16xf32>
    %107 = arith.truncf %106 : vector<16x16xf32> to vector<16x16xbf16>
    %108 = arith.truncf %93 : vector<16x16xf32> to vector<16x16xbf16>
    %cst_31 = arith.constant dense<0.000000e+00> : vector<16x16xf32>
    %109 = tpu.matmul %107, %108, %cst_31 {dimension_numbers = #tpu.dot_dimension_numbers<[1], [0], [0], [1], [0, 0, 1, 1], [], []>} : vector<16x16xbf16>, vector<16x16xbf16>, vector<16x16xf32> -> vector<16x16xf32>
    %110 = vector.extract_strided_slice %90 {offsets = [0, 16], sizes = [16, 16], strides = [1, 1]} : vector<16x96xf32> to vector<16x16xf32>
    %111 = vector.extract_strided_slice %90 {offsets = [0, 48], sizes = [16, 16], strides = [1, 1]} : vector<16x96xf32> to vector<16x16xf32>
    %112 = vector.extract_strided_slice %90 {offsets = [0, 80], sizes = [16, 16], strides = [1, 1]} : vector<16x96xf32> to vector<16x16xf32>
    %113 = arith.truncf %110 : vector<16x16xf32> to vector<16x16xbf16>
    %114 = arith.truncf %111 : vector<16x16xf32> to vector<16x16xbf16>
    %cst_32 = arith.constant dense<0.000000e+00> : vector<16x16xf32>
    %115 = tpu.matmul %113, %114, %cst_32 {dimension_numbers = #tpu.dot_dimension_numbers<[1], [1], [0], [0], [0, 0, 1, 0], [], []>} : vector<16x16xbf16>, vector<16x16xbf16>, vector<16x16xf32> -> vector<16x16xf32>
    %cst_33 = arith.constant dense<0xFF800000> : vector<16xf32>
    %116 = vector.multi_reduction <maximumf>, %115, %cst_33 [1] : vector<16x16xf32> to vector<16xf32>
    %117 = vector.shape_cast %116 : vector<16xf32> to vector<16x1xf32>
    %118 = vector.broadcast %117 : vector<16x1xf32> to vector<16x16xf32>
    %119 = arith.subf %115, %118 : vector<16x16xf32>
    %120 = math.exp %119 : vector<16x16xf32>
    %cst_34 = arith.constant dense<0.000000e+00> : vector<16xf32>
    %121 = vector.multi_reduction <add>, %120, %cst_34 [1] : vector<16x16xf32> to vector<16xf32>
    %122 = vector.shape_cast %121 : vector<16xf32> to vector<16x1xf32>
    %123 = tpu.reciprocal %122 {approx = true} : vector<16x1xf32> -> vector<16x1xf32>
    %124 = vector.broadcast %123 : vector<16x1xf32> to vector<16x16xf32>
    %125 = arith.mulf %120, %124 : vector<16x16xf32>
    %126 = arith.truncf %125 : vector<16x16xf32> to vector<16x16xbf16>
    %127 = arith.truncf %112 : vector<16x16xf32> to vector<16x16xbf16>
    %cst_35 = arith.constant dense<0.000000e+00> : vector<16x16xf32>
    %128 = tpu.matmul %126, %127, %cst_35 {dimension_numbers = #tpu.dot_dimension_numbers<[1], [0], [0], [1], [0, 0, 1, 1], [], []>} : vector<16x16xbf16>, vector<16x16xbf16>, vector<16x16xf32> -> vector<16x16xf32>
    %129 = tpu.concatenate %109, %128 in 1 : vector<16x16xf32>, vector<16x16xf32> -> vector<16x32xf32>
    %130 = arith.truncf %129 : vector<16x32xf32> to vector<16x32xbf16>
    %c0_36 = arith.constant 0 : index
    %c0_37 = arith.constant 0 : index
    %c0_38 = arith.constant 0 : index
    %131 = vector.load %arg9[%c0_36, %c0_37, %c0_38] : memref<2x32x32xbf16, #tpu.memory_space<vmem>>, vector<1x32x32xbf16>
    %132 = vector.shape_cast %131 : vector<1x32x32xbf16> to vector<32x32xbf16>
    %cst_39 = arith.constant dense<0.000000e+00> : vector<16x32xf32>
    %133 = tpu.matmul %130, %132, %cst_39 {dimension_numbers = #tpu.dot_dimension_numbers<[1], [0], [0], [1], [0, 0, 1, 1], [], []>} : vector<16x32xbf16>, vector<32x32xbf16>, vector<16x32xf32> -> vector<16x32xf32>
    %134 = arith.addf %60, %133 : vector<16x32xf32>
    %c0_40 = arith.constant 0 : index
    %c0_41 = arith.constant 0 : index
    %c0_42 = arith.constant 0 : index
    %135 = vector.load %arg10[%c0_40, %c0_41, %c0_42] : memref<2x1x32xf32, #tpu.memory_space<vmem>>, vector<1x1x32xf32>
    %136 = vector.shape_cast %135 : vector<1x1x32xf32> to vector<1x32xf32>
    %137 = vector.broadcast %136 : vector<1x32xf32> to vector<16x32xf32>
    %138 = arith.addf %134, %137 : vector<16x32xf32>
    %c0_43 = arith.constant 0 : index
    %c0_44 = arith.constant 0 : index
    %c0_45 = arith.constant 0 : index
    %139 = vector.load %arg11[%c0_43, %c0_44, %c0_45] : memref<2x1x32xf32, #tpu.memory_space<vmem>>, vector<1x1x32xf32>
    %140 = vector.shape_cast %139 : vector<1x1x32xf32> to vector<1x32xf32>
    %c0_46 = arith.constant 0 : index
    %c0_47 = arith.constant 0 : index
    %c0_48 = arith.constant 0 : index
    %141 = vector.load %arg12[%c0_46, %c0_47, %c0_48] : memref<2x1x32xf32, #tpu.memory_space<vmem>>, vector<1x1x32xf32>
    %142 = vector.shape_cast %141 : vector<1x1x32xf32> to vector<1x32xf32>
    %cst_49 = arith.constant dense<0.000000e+00> : vector<16xf32>
    %143 = vector.multi_reduction <add>, %138, %cst_49 [1] : vector<16x32xf32> to vector<16xf32>
    %144 = vector.shape_cast %143 : vector<16xf32> to vector<16x1xf32>
    %cst_50 = arith.constant 3.200000e+01 : f32
    %145 = vector.broadcast %cst_50 : f32 to vector<16x1xf32>
    %146 = arith.divf %144, %145 : vector<16x1xf32>
    %147 = vector.broadcast %146 : vector<16x1xf32> to vector<16x32xf32>
    %148 = arith.subf %138, %147 : vector<16x32xf32>
    %149 = arith.mulf %148, %148 : vector<16x32xf32>
    %cst_51 = arith.constant dense<0.000000e+00> : vector<16xf32>
    %150 = vector.multi_reduction <add>, %149, %cst_51 [1] : vector<16x32xf32> to vector<16xf32>
    %151 = vector.shape_cast %150 : vector<16xf32> to vector<16x1xf32>
    %cst_52 = arith.constant 3.200000e+01 : f32
    %152 = vector.broadcast %cst_52 : f32 to vector<16x1xf32>
    %153 = arith.divf %151, %152 : vector<16x1xf32>
    %154 = vector.broadcast %146 : vector<16x1xf32> to vector<16x32xf32>
    %155 = arith.subf %138, %154 : vector<16x32xf32>
    %cst_53 = arith.constant 9.99999974E-6 : f32
    %156 = vector.broadcast %cst_53 : f32 to vector<16x1xf32>
    %157 = arith.addf %153, %156 : vector<16x1xf32>
    %158 = math.rsqrt %157 : vector<16x1xf32>
    %159 = vector.broadcast %158 : vector<16x1xf32> to vector<16x32xf32>
    %160 = arith.mulf %155, %159 : vector<16x32xf32>
    %161 = vector.broadcast %140 : vector<1x32xf32> to vector<16x32xf32>
    %162 = arith.mulf %160, %161 : vector<16x32xf32>
    %163 = vector.broadcast %142 : vector<1x32xf32> to vector<16x32xf32>
    %164 = arith.addf %162, %163 : vector<16x32xf32>
    %165 = arith.truncf %164 : vector<16x32xf32> to vector<16x32xbf16>
    %c0_54 = arith.constant 0 : index
    %c0_55 = arith.constant 0 : index
    %c0_56 = arith.constant 0 : index
    %166 = vector.load %arg13[%c0_54, %c0_55, %c0_56] : memref<2x32x64xbf16, #tpu.memory_space<vmem>>, vector<1x32x64xbf16>
    %167 = vector.shape_cast %166 : vector<1x32x64xbf16> to vector<32x64xbf16>
    %cst_57 = arith.constant dense<0.000000e+00> : vector<16x64xf32>
    %168 = tpu.matmul %165, %167, %cst_57 {dimension_numbers = #tpu.dot_dimension_numbers<[1], [0], [0], [1], [0, 0, 1, 1], [], []>} : vector<16x32xbf16>, vector<32x64xbf16>, vector<16x64xf32> -> vector<16x64xf32>
    %c0_58 = arith.constant 0 : index
    %c0_59 = arith.constant 0 : index
    %c0_60 = arith.constant 0 : index
    %169 = vector.load %arg14[%c0_58, %c0_59, %c0_60] : memref<2x1x64xf32, #tpu.memory_space<vmem>>, vector<1x1x64xf32>
    %170 = vector.shape_cast %169 : vector<1x1x64xf32> to vector<1x64xf32>
    %171 = vector.broadcast %170 : vector<1x64xf32> to vector<16x64xf32>
    %172 = arith.addf %168, %171 : vector<16x64xf32>
    %cst_61 = arith.constant 5.000000e-01 : f32
    %173 = vector.broadcast %cst_61 : f32 to vector<16x64xf32>
    %174 = arith.mulf %173, %172 : vector<16x64xf32>
    %cst_62 = arith.constant 0.707106769 : f32
    %175 = vector.broadcast %cst_62 : f32 to vector<16x64xf32>
    %176 = arith.mulf %172, %175 : vector<16x64xf32>
    %cst_63 = arith.constant 0.000000e+00 : f32
    %177 = vector.broadcast %cst_63 : f32 to vector<16x64xf32>
    %178 = arith.cmpf oge, %176, %177 : vector<16x64xf32>
    %cst_64 = arith.constant 1.000000e+00 : f32
    %cst_65 = arith.constant -1.000000e+00 : f32
    %179 = vector.broadcast %cst_64 : f32 to vector<16x64xf32>
    %180 = vector.broadcast %cst_65 : f32 to vector<16x64xf32>
    %181 = arith.select %178, %179, %180 : vector<16x64xi1>, vector<16x64xf32>
    %182 = math.absf %176 : vector<16x64xf32>
    %cst_66 = arith.constant 0.327591091 : f32
    %183 = vector.broadcast %cst_66 : f32 to vector<16x64xf32>
    %184 = arith.mulf %183, %182 : vector<16x64xf32>
    %cst_67 = arith.constant 1.000000e+00 : f32
    %185 = vector.broadcast %cst_67 : f32 to vector<16x64xf32>
    %186 = arith.addf %185, %184 : vector<16x64xf32>
    %cst_68 = arith.constant 1.000000e+00 : f32
    %187 = vector.broadcast %cst_68 : f32 to vector<16x64xf32>
    %188 = arith.divf %187, %186 : vector<16x64xf32>
    %cst_69 = arith.constant 1.06140542 : f32
    %189 = vector.broadcast %cst_69 : f32 to vector<16x64xf32>
    %190 = arith.mulf %189, %188 : vector<16x64xf32>
    %cst_70 = arith.constant -1.45315206 : f32
    %191 = vector.broadcast %cst_70 : f32 to vector<16x64xf32>
    %192 = arith.addf %190, %191 : vector<16x64xf32>
    %193 = arith.mulf %192, %188 : vector<16x64xf32>
    %cst_71 = arith.constant 1.42141378 : f32
    %194 = vector.broadcast %cst_71 : f32 to vector<16x64xf32>
    %195 = arith.addf %193, %194 : vector<16x64xf32>
    %196 = arith.mulf %195, %188 : vector<16x64xf32>
    %cst_72 = arith.constant -0.284496725 : f32
    %197 = vector.broadcast %cst_72 : f32 to vector<16x64xf32>
    %198 = arith.addf %196, %197 : vector<16x64xf32>
    %199 = arith.mulf %198, %188 : vector<16x64xf32>
    %cst_73 = arith.constant 0.254829586 : f32
    %200 = vector.broadcast %cst_73 : f32 to vector<16x64xf32>
    %201 = arith.addf %199, %200 : vector<16x64xf32>
    %202 = arith.mulf %201, %188 : vector<16x64xf32>
    %cst_74 = arith.constant 0.000000e+00 : f32
    %203 = vector.broadcast %cst_74 : f32 to vector<16x64xf32>
    %204 = arith.subf %203, %182 : vector<16x64xf32>
    %205 = arith.mulf %204, %182 : vector<16x64xf32>
    %206 = math.exp %205 : vector<16x64xf32>
    %207 = arith.mulf %202, %206 : vector<16x64xf32>
    %cst_75 = arith.constant 1.000000e+00 : f32
    %208 = vector.broadcast %cst_75 : f32 to vector<16x64xf32>
    %209 = arith.subf %208, %207 : vector<16x64xf32>
    %210 = arith.mulf %181, %209 : vector<16x64xf32>
    %cst_76 = arith.constant 1.000000e+00 : f32
    %211 = vector.broadcast %cst_76 : f32 to vector<16x64xf32>
    %212 = arith.addf %211, %210 : vector<16x64xf32>
    %213 = arith.mulf %174, %212 : vector<16x64xf32>
    %214 = arith.truncf %213 : vector<16x64xf32> to vector<16x64xbf16>
    %c0_77 = arith.constant 0 : index
    %c0_78 = arith.constant 0 : index
    %c0_79 = arith.constant 0 : index
    %215 = vector.load %arg15[%c0_77, %c0_78, %c0_79] : memref<2x64x32xbf16, #tpu.memory_space<vmem>>, vector<1x64x32xbf16>
    %216 = vector.shape_cast %215 : vector<1x64x32xbf16> to vector<64x32xbf16>
    %cst_80 = arith.constant dense<0.000000e+00> : vector<16x32xf32>
    %217 = tpu.matmul %214, %216, %cst_80 {dimension_numbers = #tpu.dot_dimension_numbers<[1], [0], [0], [1], [0, 0, 1, 1], [], []>} : vector<16x64xbf16>, vector<64x32xbf16>, vector<16x32xf32> -> vector<16x32xf32>
    %218 = arith.addf %138, %217 : vector<16x32xf32>
    %c0_81 = arith.constant 0 : index
    %c0_82 = arith.constant 0 : index
    %c0_83 = arith.constant 0 : index
    %219 = vector.load %arg16[%c0_81, %c0_82, %c0_83] : memref<2x1x32xf32, #tpu.memory_space<vmem>>, vector<1x1x32xf32>
    %220 = vector.shape_cast %219 : vector<1x1x32xf32> to vector<1x32xf32>
    %221 = vector.broadcast %220 : vector<1x32xf32> to vector<16x32xf32>
    %222 = arith.addf %218, %221 : vector<16x32xf32>
    %c1 = arith.constant 1 : index
    %c0_84 = arith.constant 0 : index
    %c0_85 = arith.constant 0 : index
    %223 = vector.load %arg6[%c1, %c0_84, %c0_85] : memref<2x1x32xf32, #tpu.memory_space<vmem>>, vector<1x1x32xf32>
    %224 = vector.shape_cast %223 : vector<1x1x32xf32> to vector<1x32xf32>
    %c1_86 = arith.constant 1 : index
    %c0_87 = arith.constant 0 : index
    %c0_88 = arith.constant 0 : index
    %225 = vector.load %arg7[%c1_86, %c0_87, %c0_88] : memref<2x1x32xf32, #tpu.memory_space<vmem>>, vector<1x1x32xf32>
    %226 = vector.shape_cast %225 : vector<1x1x32xf32> to vector<1x32xf32>
    %cst_89 = arith.constant dense<0.000000e+00> : vector<16xf32>
    %227 = vector.multi_reduction <add>, %222, %cst_89 [1] : vector<16x32xf32> to vector<16xf32>
    %228 = vector.shape_cast %227 : vector<16xf32> to vector<16x1xf32>
    %cst_90 = arith.constant 3.200000e+01 : f32
    %229 = vector.broadcast %cst_90 : f32 to vector<16x1xf32>
    %230 = arith.divf %228, %229 : vector<16x1xf32>
    %231 = vector.broadcast %230 : vector<16x1xf32> to vector<16x32xf32>
    %232 = arith.subf %222, %231 : vector<16x32xf32>
    %233 = arith.mulf %232, %232 : vector<16x32xf32>
    %cst_91 = arith.constant dense<0.000000e+00> : vector<16xf32>
    %234 = vector.multi_reduction <add>, %233, %cst_91 [1] : vector<16x32xf32> to vector<16xf32>
    %235 = vector.shape_cast %234 : vector<16xf32> to vector<16x1xf32>
    %cst_92 = arith.constant 3.200000e+01 : f32
    %236 = vector.broadcast %cst_92 : f32 to vector<16x1xf32>
    %237 = arith.divf %235, %236 : vector<16x1xf32>
    %238 = vector.broadcast %230 : vector<16x1xf32> to vector<16x32xf32>
    %239 = arith.subf %222, %238 : vector<16x32xf32>
    %cst_93 = arith.constant 9.99999974E-6 : f32
    %240 = vector.broadcast %cst_93 : f32 to vector<16x1xf32>
    %241 = arith.addf %237, %240 : vector<16x1xf32>
    %242 = math.rsqrt %241 : vector<16x1xf32>
    %243 = vector.broadcast %242 : vector<16x1xf32> to vector<16x32xf32>
    %244 = arith.mulf %239, %243 : vector<16x32xf32>
    %245 = vector.broadcast %224 : vector<1x32xf32> to vector<16x32xf32>
    %246 = arith.mulf %244, %245 : vector<16x32xf32>
    %247 = vector.broadcast %226 : vector<1x32xf32> to vector<16x32xf32>
    %248 = arith.addf %246, %247 : vector<16x32xf32>
    %249 = arith.truncf %248 : vector<16x32xf32> to vector<16x32xbf16>
    %c1_94 = arith.constant 1 : index
    %c0_95 = arith.constant 0 : index
    %c0_96 = arith.constant 0 : index
    %250 = vector.load %arg8[%c1_94, %c0_95, %c0_96] : memref<2x32x96xbf16, #tpu.memory_space<vmem>>, vector<1x32x96xbf16>
    %251 = vector.shape_cast %250 : vector<1x32x96xbf16> to vector<32x96xbf16>
    %cst_97 = arith.constant dense<0.000000e+00> : vector<16x96xf32>
    %252 = tpu.matmul %249, %251, %cst_97 {dimension_numbers = #tpu.dot_dimension_numbers<[1], [0], [0], [1], [0, 0, 1, 1], [], []>} : vector<16x32xbf16>, vector<32x96xbf16>, vector<16x96xf32> -> vector<16x96xf32>
    %253 = vector.extract_strided_slice %252 {offsets = [0, 0], sizes = [16, 16], strides = [1, 1]} : vector<16x96xf32> to vector<16x16xf32>
    %254 = vector.extract_strided_slice %252 {offsets = [0, 32], sizes = [16, 16], strides = [1, 1]} : vector<16x96xf32> to vector<16x16xf32>
    %255 = vector.extract_strided_slice %252 {offsets = [0, 64], sizes = [16, 16], strides = [1, 1]} : vector<16x96xf32> to vector<16x16xf32>
    %256 = arith.truncf %253 : vector<16x16xf32> to vector<16x16xbf16>
    %257 = arith.truncf %254 : vector<16x16xf32> to vector<16x16xbf16>
    %cst_98 = arith.constant dense<0.000000e+00> : vector<16x16xf32>
    %258 = tpu.matmul %256, %257, %cst_98 {dimension_numbers = #tpu.dot_dimension_numbers<[1], [1], [0], [0], [0, 0, 1, 0], [], []>} : vector<16x16xbf16>, vector<16x16xbf16>, vector<16x16xf32> -> vector<16x16xf32>
    %cst_99 = arith.constant dense<0xFF800000> : vector<16xf32>
    %259 = vector.multi_reduction <maximumf>, %258, %cst_99 [1] : vector<16x16xf32> to vector<16xf32>
    %260 = vector.shape_cast %259 : vector<16xf32> to vector<16x1xf32>
    %261 = vector.broadcast %260 : vector<16x1xf32> to vector<16x16xf32>
    %262 = arith.subf %258, %261 : vector<16x16xf32>
    %263 = math.exp %262 : vector<16x16xf32>
    %cst_100 = arith.constant dense<0.000000e+00> : vector<16xf32>
    %264 = vector.multi_reduction <add>, %263, %cst_100 [1] : vector<16x16xf32> to vector<16xf32>
    %265 = vector.shape_cast %264 : vector<16xf32> to vector<16x1xf32>
    %266 = tpu.reciprocal %265 {approx = true} : vector<16x1xf32> -> vector<16x1xf32>
    %267 = vector.broadcast %266 : vector<16x1xf32> to vector<16x16xf32>
    %268 = arith.mulf %263, %267 : vector<16x16xf32>
    %269 = arith.truncf %268 : vector<16x16xf32> to vector<16x16xbf16>
    %270 = arith.truncf %255 : vector<16x16xf32> to vector<16x16xbf16>
    %cst_101 = arith.constant dense<0.000000e+00> : vector<16x16xf32>
    %271 = tpu.matmul %269, %270, %cst_101 {dimension_numbers = #tpu.dot_dimension_numbers<[1], [0], [0], [1], [0, 0, 1, 1], [], []>} : vector<16x16xbf16>, vector<16x16xbf16>, vector<16x16xf32> -> vector<16x16xf32>
    %272 = vector.extract_strided_slice %252 {offsets = [0, 16], sizes = [16, 16], strides = [1, 1]} : vector<16x96xf32> to vector<16x16xf32>
    %273 = vector.extract_strided_slice %252 {offsets = [0, 48], sizes = [16, 16], strides = [1, 1]} : vector<16x96xf32> to vector<16x16xf32>
    %274 = vector.extract_strided_slice %252 {offsets = [0, 80], sizes = [16, 16], strides = [1, 1]} : vector<16x96xf32> to vector<16x16xf32>
    %275 = arith.truncf %272 : vector<16x16xf32> to vector<16x16xbf16>
    %276 = arith.truncf %273 : vector<16x16xf32> to vector<16x16xbf16>
    %cst_102 = arith.constant dense<0.000000e+00> : vector<16x16xf32>
    %277 = tpu.matmul %275, %276, %cst_102 {dimension_numbers = #tpu.dot_dimension_numbers<[1], [1], [0], [0], [0, 0, 1, 0], [], []>} : vector<16x16xbf16>, vector<16x16xbf16>, vector<16x16xf32> -> vector<16x16xf32>
    %cst_103 = arith.constant dense<0xFF800000> : vector<16xf32>
    %278 = vector.multi_reduction <maximumf>, %277, %cst_103 [1] : vector<16x16xf32> to vector<16xf32>
    %279 = vector.shape_cast %278 : vector<16xf32> to vector<16x1xf32>
    %280 = vector.broadcast %279 : vector<16x1xf32> to vector<16x16xf32>
    %281 = arith.subf %277, %280 : vector<16x16xf32>
    %282 = math.exp %281 : vector<16x16xf32>
    %cst_104 = arith.constant dense<0.000000e+00> : vector<16xf32>
    %283 = vector.multi_reduction <add>, %282, %cst_104 [1] : vector<16x16xf32> to vector<16xf32>
    %284 = vector.shape_cast %283 : vector<16xf32> to vector<16x1xf32>
    %285 = tpu.reciprocal %284 {approx = true} : vector<16x1xf32> -> vector<16x1xf32>
    %286 = vector.broadcast %285 : vector<16x1xf32> to vector<16x16xf32>
    %287 = arith.mulf %282, %286 : vector<16x16xf32>
    %288 = arith.truncf %287 : vector<16x16xf32> to vector<16x16xbf16>
    %289 = arith.truncf %274 : vector<16x16xf32> to vector<16x16xbf16>
    %cst_105 = arith.constant dense<0.000000e+00> : vector<16x16xf32>
    %290 = tpu.matmul %288, %289, %cst_105 {dimension_numbers = #tpu.dot_dimension_numbers<[1], [0], [0], [1], [0, 0, 1, 1], [], []>} : vector<16x16xbf16>, vector<16x16xbf16>, vector<16x16xf32> -> vector<16x16xf32>
    %291 = tpu.concatenate %271, %290 in 1 : vector<16x16xf32>, vector<16x16xf32> -> vector<16x32xf32>
    %292 = arith.truncf %291 : vector<16x32xf32> to vector<16x32xbf16>
    %c1_106 = arith.constant 1 : index
    %c0_107 = arith.constant 0 : index
    %c0_108 = arith.constant 0 : index
    %293 = vector.load %arg9[%c1_106, %c0_107, %c0_108] : memref<2x32x32xbf16, #tpu.memory_space<vmem>>, vector<1x32x32xbf16>
    %294 = vector.shape_cast %293 : vector<1x32x32xbf16> to vector<32x32xbf16>
    %cst_109 = arith.constant dense<0.000000e+00> : vector<16x32xf32>
    %295 = tpu.matmul %292, %294, %cst_109 {dimension_numbers = #tpu.dot_dimension_numbers<[1], [0], [0], [1], [0, 0, 1, 1], [], []>} : vector<16x32xbf16>, vector<32x32xbf16>, vector<16x32xf32> -> vector<16x32xf32>
    %296 = arith.addf %222, %295 : vector<16x32xf32>
    %c1_110 = arith.constant 1 : index
    %c0_111 = arith.constant 0 : index
    %c0_112 = arith.constant 0 : index
    %297 = vector.load %arg10[%c1_110, %c0_111, %c0_112] : memref<2x1x32xf32, #tpu.memory_space<vmem>>, vector<1x1x32xf32>
    %298 = vector.shape_cast %297 : vector<1x1x32xf32> to vector<1x32xf32>
    %299 = vector.broadcast %298 : vector<1x32xf32> to vector<16x32xf32>
    %300 = arith.addf %296, %299 : vector<16x32xf32>
    %c1_113 = arith.constant 1 : index
    %c0_114 = arith.constant 0 : index
    %c0_115 = arith.constant 0 : index
    %301 = vector.load %arg11[%c1_113, %c0_114, %c0_115] : memref<2x1x32xf32, #tpu.memory_space<vmem>>, vector<1x1x32xf32>
    %302 = vector.shape_cast %301 : vector<1x1x32xf32> to vector<1x32xf32>
    %c1_116 = arith.constant 1 : index
    %c0_117 = arith.constant 0 : index
    %c0_118 = arith.constant 0 : index
    %303 = vector.load %arg12[%c1_116, %c0_117, %c0_118] : memref<2x1x32xf32, #tpu.memory_space<vmem>>, vector<1x1x32xf32>
    %304 = vector.shape_cast %303 : vector<1x1x32xf32> to vector<1x32xf32>
    %cst_119 = arith.constant dense<0.000000e+00> : vector<16xf32>
    %305 = vector.multi_reduction <add>, %300, %cst_119 [1] : vector<16x32xf32> to vector<16xf32>
    %306 = vector.shape_cast %305 : vector<16xf32> to vector<16x1xf32>
    %cst_120 = arith.constant 3.200000e+01 : f32
    %307 = vector.broadcast %cst_120 : f32 to vector<16x1xf32>
    %308 = arith.divf %306, %307 : vector<16x1xf32>
    %309 = vector.broadcast %308 : vector<16x1xf32> to vector<16x32xf32>
    %310 = arith.subf %300, %309 : vector<16x32xf32>
    %311 = arith.mulf %310, %310 : vector<16x32xf32>
    %cst_121 = arith.constant dense<0.000000e+00> : vector<16xf32>
    %312 = vector.multi_reduction <add>, %311, %cst_121 [1] : vector<16x32xf32> to vector<16xf32>
    %313 = vector.shape_cast %312 : vector<16xf32> to vector<16x1xf32>
    %cst_122 = arith.constant 3.200000e+01 : f32
    %314 = vector.broadcast %cst_122 : f32 to vector<16x1xf32>
    %315 = arith.divf %313, %314 : vector<16x1xf32>
    %316 = vector.broadcast %308 : vector<16x1xf32> to vector<16x32xf32>
    %317 = arith.subf %300, %316 : vector<16x32xf32>
    %cst_123 = arith.constant 9.99999974E-6 : f32
    %318 = vector.broadcast %cst_123 : f32 to vector<16x1xf32>
    %319 = arith.addf %315, %318 : vector<16x1xf32>
    %320 = math.rsqrt %319 : vector<16x1xf32>
    %321 = vector.broadcast %320 : vector<16x1xf32> to vector<16x32xf32>
    %322 = arith.mulf %317, %321 : vector<16x32xf32>
    %323 = vector.broadcast %302 : vector<1x32xf32> to vector<16x32xf32>
    %324 = arith.mulf %322, %323 : vector<16x32xf32>
    %325 = vector.broadcast %304 : vector<1x32xf32> to vector<16x32xf32>
    %326 = arith.addf %324, %325 : vector<16x32xf32>
    %327 = arith.truncf %326 : vector<16x32xf32> to vector<16x32xbf16>
    %c1_124 = arith.constant 1 : index
    %c0_125 = arith.constant 0 : index
    %c0_126 = arith.constant 0 : index
    %328 = vector.load %arg13[%c1_124, %c0_125, %c0_126] : memref<2x32x64xbf16, #tpu.memory_space<vmem>>, vector<1x32x64xbf16>
    %329 = vector.shape_cast %328 : vector<1x32x64xbf16> to vector<32x64xbf16>
    %cst_127 = arith.constant dense<0.000000e+00> : vector<16x64xf32>
    %330 = tpu.matmul %327, %329, %cst_127 {dimension_numbers = #tpu.dot_dimension_numbers<[1], [0], [0], [1], [0, 0, 1, 1], [], []>} : vector<16x32xbf16>, vector<32x64xbf16>, vector<16x64xf32> -> vector<16x64xf32>
    %c1_128 = arith.constant 1 : index
    %c0_129 = arith.constant 0 : index
    %c0_130 = arith.constant 0 : index
    %331 = vector.load %arg14[%c1_128, %c0_129, %c0_130] : memref<2x1x64xf32, #tpu.memory_space<vmem>>, vector<1x1x64xf32>
    %332 = vector.shape_cast %331 : vector<1x1x64xf32> to vector<1x64xf32>
    %333 = vector.broadcast %332 : vector<1x64xf32> to vector<16x64xf32>
    %334 = arith.addf %330, %333 : vector<16x64xf32>
    %cst_131 = arith.constant 5.000000e-01 : f32
    %335 = vector.broadcast %cst_131 : f32 to vector<16x64xf32>
    %336 = arith.mulf %335, %334 : vector<16x64xf32>
    %cst_132 = arith.constant 0.707106769 : f32
    %337 = vector.broadcast %cst_132 : f32 to vector<16x64xf32>
    %338 = arith.mulf %334, %337 : vector<16x64xf32>
    %cst_133 = arith.constant 0.000000e+00 : f32
    %339 = vector.broadcast %cst_133 : f32 to vector<16x64xf32>
    %340 = arith.cmpf oge, %338, %339 : vector<16x64xf32>
    %cst_134 = arith.constant 1.000000e+00 : f32
    %cst_135 = arith.constant -1.000000e+00 : f32
    %341 = vector.broadcast %cst_134 : f32 to vector<16x64xf32>
    %342 = vector.broadcast %cst_135 : f32 to vector<16x64xf32>
    %343 = arith.select %340, %341, %342 : vector<16x64xi1>, vector<16x64xf32>
    %344 = math.absf %338 : vector<16x64xf32>
    %cst_136 = arith.constant 0.327591091 : f32
    %345 = vector.broadcast %cst_136 : f32 to vector<16x64xf32>
    %346 = arith.mulf %345, %344 : vector<16x64xf32>
    %cst_137 = arith.constant 1.000000e+00 : f32
    %347 = vector.broadcast %cst_137 : f32 to vector<16x64xf32>
    %348 = arith.addf %347, %346 : vector<16x64xf32>
    %cst_138 = arith.constant 1.000000e+00 : f32
    %349 = vector.broadcast %cst_138 : f32 to vector<16x64xf32>
    %350 = arith.divf %349, %348 : vector<16x64xf32>
    %cst_139 = arith.constant 1.06140542 : f32
    %351 = vector.broadcast %cst_139 : f32 to vector<16x64xf32>
    %352 = arith.mulf %351, %350 : vector<16x64xf32>
    %cst_140 = arith.constant -1.45315206 : f32
    %353 = vector.broadcast %cst_140 : f32 to vector<16x64xf32>
    %354 = arith.addf %352, %353 : vector<16x64xf32>
    %355 = arith.mulf %354, %350 : vector<16x64xf32>
    %cst_141 = arith.constant 1.42141378 : f32
    %356 = vector.broadcast %cst_141 : f32 to vector<16x64xf32>
    %357 = arith.addf %355, %356 : vector<16x64xf32>
    %358 = arith.mulf %357, %350 : vector<16x64xf32>
    %cst_142 = arith.constant -0.284496725 : f32
    %359 = vector.broadcast %cst_142 : f32 to vector<16x64xf32>
    %360 = arith.addf %358, %359 : vector<16x64xf32>
    %361 = arith.mulf %360, %350 : vector<16x64xf32>
    %cst_143 = arith.constant 0.254829586 : f32
    %362 = vector.broadcast %cst_143 : f32 to vector<16x64xf32>
    %363 = arith.addf %361, %362 : vector<16x64xf32>
    %364 = arith.mulf %363, %350 : vector<16x64xf32>
    %cst_144 = arith.constant 0.000000e+00 : f32
    %365 = vector.broadcast %cst_144 : f32 to vector<16x64xf32>
    %366 = arith.subf %365, %344 : vector<16x64xf32>
    %367 = arith.mulf %366, %344 : vector<16x64xf32>
    %368 = math.exp %367 : vector<16x64xf32>
    %369 = arith.mulf %364, %368 : vector<16x64xf32>
    %cst_145 = arith.constant 1.000000e+00 : f32
    %370 = vector.broadcast %cst_145 : f32 to vector<16x64xf32>
    %371 = arith.subf %370, %369 : vector<16x64xf32>
    %372 = arith.mulf %343, %371 : vector<16x64xf32>
    %cst_146 = arith.constant 1.000000e+00 : f32
    %373 = vector.broadcast %cst_146 : f32 to vector<16x64xf32>
    %374 = arith.addf %373, %372 : vector<16x64xf32>
    %375 = arith.mulf %336, %374 : vector<16x64xf32>
    %376 = arith.truncf %375 : vector<16x64xf32> to vector<16x64xbf16>
    %c1_147 = arith.constant 1 : index
    %c0_148 = arith.constant 0 : index
    %c0_149 = arith.constant 0 : index
    %377 = vector.load %arg15[%c1_147, %c0_148, %c0_149] : memref<2x64x32xbf16, #tpu.memory_space<vmem>>, vector<1x64x32xbf16>
    %378 = vector.shape_cast %377 : vector<1x64x32xbf16> to vector<64x32xbf16>
    %cst_150 = arith.constant dense<0.000000e+00> : vector<16x32xf32>
    %379 = tpu.matmul %376, %378, %cst_150 {dimension_numbers = #tpu.dot_dimension_numbers<[1], [0], [0], [1], [0, 0, 1, 1], [], []>} : vector<16x64xbf16>, vector<64x32xbf16>, vector<16x32xf32> -> vector<16x32xf32>
    %380 = arith.addf %300, %379 : vector<16x32xf32>
    %c1_151 = arith.constant 1 : index
    %c0_152 = arith.constant 0 : index
    %c0_153 = arith.constant 0 : index
    %381 = vector.load %arg16[%c1_151, %c0_152, %c0_153] : memref<2x1x32xf32, #tpu.memory_space<vmem>>, vector<1x1x32xf32>
    %382 = vector.shape_cast %381 : vector<1x1x32xf32> to vector<1x32xf32>
    %383 = vector.broadcast %382 : vector<1x32xf32> to vector<16x32xf32>
    %384 = arith.addf %380, %383 : vector<16x32xf32>
    %385 = arith.truncf %384 : vector<16x32xf32> to vector<16x32xbf16>
    %c0_154 = arith.constant 0 : index
    %c0_155 = arith.constant 0 : index
    %386 = vector.load %arg17[%c0_154, %c0_155] : memref<32x64xbf16, #tpu.memory_space<vmem>>, vector<32x64xbf16>
    %cst_156 = arith.constant dense<0.000000e+00> : vector<16x64xf32>
    %387 = tpu.matmul %385, %386, %cst_156 {dimension_numbers = #tpu.dot_dimension_numbers<[1], [0], [0], [1], [0, 0, 1, 1], [], []>} : vector<16x32xbf16>, vector<32x64xbf16>, vector<16x64xf32> -> vector<16x64xf32>
    %cst_157 = arith.constant 0.176776692 : f32
    %388 = vector.broadcast %cst_157 : f32 to vector<16x64xf32>
    %389 = arith.mulf %387, %388 : vector<16x64xf32>
    %cst_158 = arith.constant dense<0xFF800000> : vector<16xf32>
    %390 = vector.multi_reduction <maximumf>, %389, %cst_158 [1] : vector<16x64xf32> to vector<16xf32>
    %391 = vector.shape_cast %390 : vector<16xf32> to vector<16x1xf32>
    %392 = vector.broadcast %391 : vector<16x1xf32> to vector<16x64xf32>
    %393 = arith.subf %389, %392 : vector<16x64xf32>
    %394 = math.exp %393 : vector<16x64xf32>
    %cst_159 = arith.constant dense<0.000000e+00> : vector<16xf32>
    %395 = vector.multi_reduction <add>, %394, %cst_159 [1] : vector<16x64xf32> to vector<16xf32>
    %396 = vector.shape_cast %395 : vector<16xf32> to vector<16x1xf32>
    %397 = tpu.reciprocal %396 {approx = true} : vector<16x1xf32> -> vector<16x1xf32>
    %398 = vector.broadcast %397 : vector<16x1xf32> to vector<16x64xf32>
    %399 = arith.mulf %394, %398 : vector<16x64xf32>
    %400 = arith.truncf %399 : vector<16x64xf32> to vector<16x64xbf16>
    %c0_160 = arith.constant 0 : index
    %c0_161 = arith.constant 0 : index
    %401 = vector.load %arg17[%c0_160, %c0_161] : memref<32x64xbf16, #tpu.memory_space<vmem>>, vector<32x64xbf16>
    %cst_162 = arith.constant dense<0.000000e+00> : vector<16x32xf32>
    %402 = tpu.matmul %400, %401, %cst_162 {dimension_numbers = #tpu.dot_dimension_numbers<[1], [1], [0], [0], [0, 0, 1, 0], [], []>} : vector<16x64xbf16>, vector<32x64xbf16>, vector<16x32xf32> -> vector<16x32xf32>
    %cst_163 = arith.constant dense<0xFF800000> : vector<32xf32>
    %403 = vector.multi_reduction <maximumf>, %402, %cst_163 [0] : vector<16x32xf32> to vector<32xf32>
    %404 = vector.shape_cast %403 : vector<32xf32> to vector<1x32xf32>
    %c0_164 = arith.constant 0 : index
    %c0_165 = arith.constant 0 : index
    %405 = vector.load %arg18[%c0_164, %c0_165] : memref<1x32xf32, #tpu.memory_space<vmem>>, vector<1x32xf32>
    %c0_166 = arith.constant 0 : index
    %c0_167 = arith.constant 0 : index
    %406 = vector.load %arg19[%c0_166, %c0_167] : memref<1x32xf32, #tpu.memory_space<vmem>>, vector<1x32xf32>
    %cst_168 = arith.constant dense<0.000000e+00> : vector<1xf32>
    %407 = vector.multi_reduction <add>, %404, %cst_168 [1] : vector<1x32xf32> to vector<1xf32>
    %408 = vector.shape_cast %407 : vector<1xf32> to vector<1x1xf32>
    %cst_169 = arith.constant 3.200000e+01 : f32
    %409 = vector.broadcast %cst_169 : f32 to vector<1x1xf32>
    %410 = arith.divf %408, %409 : vector<1x1xf32>
    %411 = vector.broadcast %410 : vector<1x1xf32> to vector<1x32xf32>
    %412 = arith.subf %404, %411 : vector<1x32xf32>
    %413 = arith.mulf %412, %412 : vector<1x32xf32>
    %cst_170 = arith.constant dense<0.000000e+00> : vector<1xf32>
    %414 = vector.multi_reduction <add>, %413, %cst_170 [1] : vector<1x32xf32> to vector<1xf32>
    %415 = vector.shape_cast %414 : vector<1xf32> to vector<1x1xf32>
    %cst_171 = arith.constant 3.200000e+01 : f32
    %416 = vector.broadcast %cst_171 : f32 to vector<1x1xf32>
    %417 = arith.divf %415, %416 : vector<1x1xf32>
    %418 = vector.broadcast %410 : vector<1x1xf32> to vector<1x32xf32>
    %419 = arith.subf %404, %418 : vector<1x32xf32>
    %cst_172 = arith.constant 9.99999974E-6 : f32
    %420 = vector.broadcast %cst_172 : f32 to vector<1x1xf32>
    %421 = arith.addf %417, %420 : vector<1x1xf32>
    %422 = math.rsqrt %421 : vector<1x1xf32>
    %423 = vector.broadcast %422 : vector<1x1xf32> to vector<1x32xf32>
    %424 = arith.mulf %419, %423 : vector<1x32xf32>
    %425 = arith.mulf %424, %405 : vector<1x32xf32>
    %426 = arith.addf %425, %406 : vector<1x32xf32>
    %427 = arith.truncf %426 : vector<1x32xf32> to vector<1x32xbf16>
    %c0_173 = arith.constant 0 : index
    %c0_174 = arith.constant 0 : index
    %428 = vector.load %arg20[%c0_173, %c0_174] : memref<32x64xbf16, #tpu.memory_space<vmem>>, vector<32x64xbf16>
    %cst_175 = arith.constant dense<0.000000e+00> : vector<1x64xf32>
    %429 = tpu.matmul %427, %428, %cst_175 {dimension_numbers = #tpu.dot_dimension_numbers<[1], [0], [0], [1], [0, 0, 1, 1], [], []>} : vector<1x32xbf16>, vector<32x64xbf16>, vector<1x64xf32> -> vector<1x64xf32>
    %c0_176 = arith.constant 0 : index
    %c0_177 = arith.constant 0 : index
    %430 = vector.load %arg21[%c0_176, %c0_177] : memref<1x64xf32, #tpu.memory_space<vmem>>, vector<1x64xf32>
    %431 = arith.addf %429, %430 : vector<1x64xf32>
    %cst_178 = arith.constant 5.000000e-01 : f32
    %432 = vector.broadcast %cst_178 : f32 to vector<1x64xf32>
    %433 = arith.mulf %432, %431 : vector<1x64xf32>
    %cst_179 = arith.constant 0.707106769 : f32
    %434 = vector.broadcast %cst_179 : f32 to vector<1x64xf32>
    %435 = arith.mulf %431, %434 : vector<1x64xf32>
    %cst_180 = arith.constant 0.000000e+00 : f32
    %436 = vector.broadcast %cst_180 : f32 to vector<1x64xf32>
    %437 = arith.cmpf oge, %435, %436 : vector<1x64xf32>
    %cst_181 = arith.constant 1.000000e+00 : f32
    %cst_182 = arith.constant -1.000000e+00 : f32
    %438 = vector.broadcast %cst_181 : f32 to vector<1x64xf32>
    %439 = vector.broadcast %cst_182 : f32 to vector<1x64xf32>
    %440 = arith.select %437, %438, %439 : vector<1x64xi1>, vector<1x64xf32>
    %441 = math.absf %435 : vector<1x64xf32>
    %cst_183 = arith.constant 0.327591091 : f32
    %442 = vector.broadcast %cst_183 : f32 to vector<1x64xf32>
    %443 = arith.mulf %442, %441 : vector<1x64xf32>
    %cst_184 = arith.constant 1.000000e+00 : f32
    %444 = vector.broadcast %cst_184 : f32 to vector<1x64xf32>
    %445 = arith.addf %444, %443 : vector<1x64xf32>
    %cst_185 = arith.constant 1.000000e+00 : f32
    %446 = vector.broadcast %cst_185 : f32 to vector<1x64xf32>
    %447 = arith.divf %446, %445 : vector<1x64xf32>
    %cst_186 = arith.constant 1.06140542 : f32
    %448 = vector.broadcast %cst_186 : f32 to vector<1x64xf32>
    %449 = arith.mulf %448, %447 : vector<1x64xf32>
    %cst_187 = arith.constant -1.45315206 : f32
    %450 = vector.broadcast %cst_187 : f32 to vector<1x64xf32>
    %451 = arith.addf %449, %450 : vector<1x64xf32>
    %452 = arith.mulf %451, %447 : vector<1x64xf32>
    %cst_188 = arith.constant 1.42141378 : f32
    %453 = vector.broadcast %cst_188 : f32 to vector<1x64xf32>
    %454 = arith.addf %452, %453 : vector<1x64xf32>
    %455 = arith.mulf %454, %447 : vector<1x64xf32>
    %cst_189 = arith.constant -0.284496725 : f32
    %456 = vector.broadcast %cst_189 : f32 to vector<1x64xf32>
    %457 = arith.addf %455, %456 : vector<1x64xf32>
    %458 = arith.mulf %457, %447 : vector<1x64xf32>
    %cst_190 = arith.constant 0.254829586 : f32
    %459 = vector.broadcast %cst_190 : f32 to vector<1x64xf32>
    %460 = arith.addf %458, %459 : vector<1x64xf32>
    %461 = arith.mulf %460, %447 : vector<1x64xf32>
    %cst_191 = arith.constant 0.000000e+00 : f32
    %462 = vector.broadcast %cst_191 : f32 to vector<1x64xf32>
    %463 = arith.subf %462, %441 : vector<1x64xf32>
    %464 = arith.mulf %463, %441 : vector<1x64xf32>
    %465 = math.exp %464 : vector<1x64xf32>
    %466 = arith.mulf %461, %465 : vector<1x64xf32>
    %cst_192 = arith.constant 1.000000e+00 : f32
    %467 = vector.broadcast %cst_192 : f32 to vector<1x64xf32>
    %468 = arith.subf %467, %466 : vector<1x64xf32>
    %469 = arith.mulf %440, %468 : vector<1x64xf32>
    %cst_193 = arith.constant 1.000000e+00 : f32
    %470 = vector.broadcast %cst_193 : f32 to vector<1x64xf32>
    %471 = arith.addf %470, %469 : vector<1x64xf32>
    %472 = arith.mulf %433, %471 : vector<1x64xf32>
    %473 = arith.truncf %472 : vector<1x64xf32> to vector<1x64xbf16>
    %c0_194 = arith.constant 0 : index
    %c0_195 = arith.constant 0 : index
    %474 = vector.load %arg22[%c0_194, %c0_195] : memref<64x39xbf16, #tpu.memory_space<vmem>>, vector<64x39xbf16>
    %cst_196 = arith.constant dense<0.000000e+00> : vector<1x39xf32>
    %475 = tpu.matmul %473, %474, %cst_196 {dimension_numbers = #tpu.dot_dimension_numbers<[1], [0], [0], [1], [0, 0, 1, 1], [], []>} : vector<1x64xbf16>, vector<64x39xbf16>, vector<1x39xf32> -> vector<1x39xf32>
    %c0_197 = arith.constant 0 : index
    %c0_198 = arith.constant 0 : index
    %476 = vector.load %arg23[%c0_197, %c0_198] : memref<1x39xf32, #tpu.memory_space<vmem>>, vector<1x39xf32>
    %477 = arith.addf %475, %476 : vector<1x39xf32>
    %c0_199 = arith.constant 0 : index
    %c0_200 = arith.constant 0 : index
    %c0_201 = arith.constant 0 : index
    %478 = vector.load %arg24[%c0_199, %c0_200, %c0_201] : memref<1x1x39xf32, #tpu.memory_space<vmem>>, vector<1x1x39xf32>
    %479 = vector.shape_cast %478 : vector<1x1x39xf32> to vector<1x39xf32>
    %480 = vector.shape_cast %477 : vector<1x39xf32> to vector<1x1x39xf32>
    tpu.vector_store %arg24[%c0_199, %c0_200, %c0_201], %480 {strides = array<i32>} : memref<1x1x39xf32, #tpu.memory_space<vmem>>, vector<1x1x39xf32>,
    return
  }
  func.func @transform_0(%arg0: i32) -> (i32, i32, i32) {
    %c0_i32 = arith.constant 0 : i32
    %c0_i32_0 = arith.constant 0 : i32
    %c0_i32_1 = arith.constant 0 : i32
    return %arg0, %c0_i32, %c0_i32_0 : i32, i32, i32
  }
  func.func @transform_1(%arg0: i32) -> (i32, i32, i32) {
    %c0_i32 = arith.constant 0 : i32
    %c0_i32_0 = arith.constant 0 : i32
    %c0_i32_1 = arith.constant 0 : i32
    return %arg0, %c0_i32, %c0_i32_0 : i32, i32, i32
  }
  func.func @transform_2(%arg0: i32) -> (i32, i32) {
    %c0_i32 = arith.constant 0 : i32
    %c0_i32_0 = arith.constant 0 : i32
    %c0_i32_1 = arith.constant 0 : i32
    return %c0_i32, %c0_i32_0 : i32, i32
  }
  func.func @transform_3(%arg0: i32) -> (i32, i32) {
    %c0_i32 = arith.constant 0 : i32
    %c0_i32_0 = arith.constant 0 : i32
    %c0_i32_1 = arith.constant 0 : i32
    return %c0_i32, %c0_i32_0 : i32, i32
  }
  func.func @transform_4(%arg0: i32) -> (i32, i32) {
    %c0_i32 = arith.constant 0 : i32
    %c0_i32_0 = arith.constant 0 : i32
    %c0_i32_1 = arith.constant 0 : i32
    return %c0_i32, %c0_i32_0 : i32, i32
  }
  func.func @transform_5(%arg0: i32) -> (i32, i32, i32) {
    %c0_i32 = arith.constant 0 : i32
    %c0_i32_0 = arith.constant 0 : i32
    %c0_i32_1 = arith.constant 0 : i32
    %c0_i32_2 = arith.constant 0 : i32
    return %c0_i32, %c0_i32_0, %c0_i32_1 : i32, i32, i32
  }
  func.func @transform_6(%arg0: i32) -> (i32, i32, i32) {
    %c0_i32 = arith.constant 0 : i32
    %c0_i32_0 = arith.constant 0 : i32
    %c0_i32_1 = arith.constant 0 : i32
    %c0_i32_2 = arith.constant 0 : i32
    return %c0_i32, %c0_i32_0, %c0_i32_1 : i32, i32, i32
  }
  func.func @transform_7(%arg0: i32) -> (i32, i32, i32) {
    %c0_i32 = arith.constant 0 : i32
    %c0_i32_0 = arith.constant 0 : i32
    %c0_i32_1 = arith.constant 0 : i32
    %c0_i32_2 = arith.constant 0 : i32
    return %c0_i32, %c0_i32_0, %c0_i32_1 : i32, i32, i32
  }
  func.func @transform_8(%arg0: i32) -> (i32, i32, i32) {
    %c0_i32 = arith.constant 0 : i32
    %c0_i32_0 = arith.constant 0 : i32
    %c0_i32_1 = arith.constant 0 : i32
    %c0_i32_2 = arith.constant 0 : i32
    return %c0_i32, %c0_i32_0, %c0_i32_1 : i32, i32, i32
  }
  func.func @transform_9(%arg0: i32) -> (i32, i32, i32) {
    %c0_i32 = arith.constant 0 : i32
    %c0_i32_0 = arith.constant 0 : i32
    %c0_i32_1 = arith.constant 0 : i32
    %c0_i32_2 = arith.constant 0 : i32
    return %c0_i32, %c0_i32_0, %c0_i32_1 : i32, i32, i32
  }
  func.func @transform_10(%arg0: i32) -> (i32, i32, i32) {
    %c0_i32 = arith.constant 0 : i32
    %c0_i32_0 = arith.constant 0 : i32
    %c0_i32_1 = arith.constant 0 : i32
    %c0_i32_2 = arith.constant 0 : i32
    return %c0_i32, %c0_i32_0, %c0_i32_1 : i32, i32, i32
  }
  func.func @transform_11(%arg0: i32) -> (i32, i32, i32) {
    %c0_i32 = arith.constant 0 : i32
    %c0_i32_0 = arith.constant 0 : i32
    %c0_i32_1 = arith.constant 0 : i32
    %c0_i32_2 = arith.constant 0 : i32
    return %c0_i32, %c0_i32_0, %c0_i32_1 : i32, i32, i32
  }
  func.func @transform_12(%arg0: i32) -> (i32, i32, i32) {
    %c0_i32 = arith.constant 0 : i32
    %c0_i32_0 = arith.constant 0 : i32
    %c0_i32_1 = arith.constant 0 : i32
    %c0_i32_2 = arith.constant 0 : i32
    return %c0_i32, %c0_i32_0, %c0_i32_1 : i32, i32, i32
  }
  func.func @transform_13(%arg0: i32) -> (i32, i32, i32) {
    %c0_i32 = arith.constant 0 : i32
    %c0_i32_0 = arith.constant 0 : i32
    %c0_i32_1 = arith.constant 0 : i32
    %c0_i32_2 = arith.constant 0 : i32
    return %c0_i32, %c0_i32_0, %c0_i32_1 : i32, i32, i32
  }
  func.func @transform_14(%arg0: i32) -> (i32, i32, i32) {
    %c0_i32 = arith.constant 0 : i32
    %c0_i32_0 = arith.constant 0 : i32
    %c0_i32_1 = arith.constant 0 : i32
    %c0_i32_2 = arith.constant 0 : i32
    return %c0_i32, %c0_i32_0, %c0_i32_1 : i32, i32, i32
  }
  func.func @transform_15(%arg0: i32) -> (i32, i32, i32) {
    %c0_i32 = arith.constant 0 : i32
    %c0_i32_0 = arith.constant 0 : i32
    %c0_i32_1 = arith.constant 0 : i32
    %c0_i32_2 = arith.constant 0 : i32
    return %c0_i32, %c0_i32_0, %c0_i32_1 : i32, i32, i32
  }
  func.func @transform_16(%arg0: i32) -> (i32, i32) {
    %c0_i32 = arith.constant 0 : i32
    %c0_i32_0 = arith.constant 0 : i32
    %c0_i32_1 = arith.constant 0 : i32
    return %c0_i32, %c0_i32_0 : i32, i32
  }
  func.func @transform_17(%arg0: i32) -> (i32, i32) {
    %c0_i32 = arith.constant 0 : i32
    %c0_i32_0 = arith.constant 0 : i32
    %c0_i32_1 = arith.constant 0 : i32
    return %c0_i32, %c0_i32_0 : i32, i32
  }
  func.func @transform_18(%arg0: i32) -> (i32, i32) {
    %c0_i32 = arith.constant 0 : i32
    %c0_i32_0 = arith.constant 0 : i32
    %c0_i32_1 = arith.constant 0 : i32
    return %c0_i32, %c0_i32_0 : i32, i32
  }
  func.func @transform_19(%arg0: i32) -> (i32, i32) {
    %c0_i32 = arith.constant 0 : i32
    %c0_i32_0 = arith.constant 0 : i32
    %c0_i32_1 = arith.constant 0 : i32
    return %c0_i32, %c0_i32_0 : i32, i32
  }
  func.func @transform_20(%arg0: i32) -> (i32, i32) {
    %c0_i32 = arith.constant 0 : i32
    %c0_i32_0 = arith.constant 0 : i32
    %c0_i32_1 = arith.constant 0 : i32
    return %c0_i32, %c0_i32_0 : i32, i32
  }
  func.func @transform_21(%arg0: i32) -> (i32, i32) {
    %c0_i32 = arith.constant 0 : i32
    %c0_i32_0 = arith.constant 0 : i32
    %c0_i32_1 = arith.constant 0 : i32
    return %c0_i32, %c0_i32_0 : i32, i32
  }
  func.func @transform_22(%arg0: i32) -> (i32, i32) {
    %c0_i32 = arith.constant 0 : i32
    %c0_i32_0 = arith.constant 0 : i32
    %c0_i32_1 = arith.constant 0 : i32
    return %c0_i32, %c0_i32_0 : i32, i32
  }
  func.func @transform_23(%arg0: i32) -> (i32, i32, i32) {
    %c0_i32 = arith.constant 0 : i32
    %c0_i32_0 = arith.constant 0 : i32
    %c0_i32_1 = arith.constant 0 : i32
    return %arg0, %c0_i32, %c0_i32_0 : i32, i32, i32
  }
}

</mosaic_0001>

<bundles_post_ra>
// kernel: custom-call.24
= control target key start
LH: loop header
LB: loop body
LE: loop exit
PB: predicated region body
PF: predicated region fallthrough
CT: control target
= control target key end

     0   :  { %s6_s0 = inlined_call_operand.vmem [shape: f32[2,32], index: 0, kind: output, shape index: {}]  }

// kernel: model_forward.1
= control target key start
LH: loop header
LB: loop body
LE: loop exit
PB: predicated region body
PF: predicated region fallthrough
CT: control target
= control target key end

     0   :  { %s4319_s0 = inlined_call_operand.vmem [shape: bf16[2,384,7], index: 0, kind: input, shape index: {}]   ;;  %s4320_s1 = inlined_call_operand.vmem [shape: f32[2,16,4], index: 1, kind: input, shape index: {}]   ;;  %s4321_s2 = inlined_call_operand.vmem [shape: bf16[7,32], index: 2, kind: input, shape index: {}]   ;;  %s4322_s3 = inlined_call_operand.vmem [shape: f32[4,32], index: 3, kind: input, shape index: {}]   ;;  %s4323_s4 = inlined_call_operand.vmem [shape: f32[1,32], index: 4, kind: input, shape index: {}]   ;;  %s4324_s5 = inlined_call_operand.vmem [shape: f32[2,1,32], index: 5, kind: input, shape index: {}]   ;;  %s4325_s6 = inlined_call_operand.vmem [shape: f32[2,1,32], index: 6, kind: input, shape index: {}]   ;;  %s4326_s7 = inlined_call_operand.vmem [shape: bf16[2,32,96], index: 7, kind: input, shape index: {}]   ;;  %s4327_s8 = inlined_call_operand.vmem [shape: bf16[2,32,32], index: 8, kind: input, shape index: {}]   ;;  %s4328_s9 = inlined_call_operand.vmem [shape: f32[2,1,32], index: 9, kind: input, shape index: {}]   ;;  %s4329_s10 = inlined_call_operand.vmem [shape: f32[2,1,32], index: 10, kind: input, shape index: {}]   ;;  %s4330_s11 = inlined_call_operand.vmem [shape: f32[2,1,32], index: 11, kind: input, shape index: {}]   ;;  %s4331_s12 = inlined_call_operand.vmem [shape: bf16[2,32,64], index: 12, kind: input, shape index: {}]   ;;  %s4332_s13 = inlined_call_operand.vmem [shape: f32[2,1,64], index: 13, kind: input, shape index: {}]   ;;  %s4333_s14 = inlined_call_operand.vmem [shape: bf16[2,64,32], index: 14, kind: input, shape index: {}]   ;;  %s4334_s15 = inlined_call_operand.vmem [shape: f32[2,1,32], index: 15, kind: input, shape index: {}]   ;;  %s4335_s16 = inlined_call_operand.vmem [shape: bf16[32,64], index: 16, kind: input, shape index: {}]   ;;  %s4336_s17 = inlined_call_operand.vmem [shape: f32[1,32], index: 17, kind: input, shape index: {}]   ;;  %s4337_s18 = inlined_call_operand.vmem [shape: f32[1,32], index: 18, kind: input, shape index: {}]   ;;  %s4338_s19 = inlined_call_operand.vmem [shape: bf16[32,64], index: 19, kind: input, shape index: {}]   ;;  %s4339_s20 = inlined_call_operand.vmem [shape: f32[1,64], index: 20, kind: input, shape index: {}]   ;;  %s4340_s21 = inlined_call_operand.vmem [shape: bf16[64,39], index: 21, kind: input, shape index: {}]   ;;  %s4341_s22 = inlined_call_operand.vmem [shape: f32[1,39], index: 22, kind: input, shape index: {}]   ;;  %s4342_s23 = inlined_call_operand.vmem [shape: f32[2,1,39], index: 23, kind: output, shape index: {}]  }
   0x1   :  { %4349 = sst [smem:[#allocation2_spill]] %s4319_s0 }
   0x2   :  { %4350 = sst [smem:[#allocation3_spill]] %s4320_s1 }
   0x3   :  { %4351 = sst [smem:[#allocation4_spill]] %s4321_s2 }
   0x4   :  { %4352 = sst [smem:[#allocation5_spill]] %s4322_s3 }
   0x5   :  { %4353 = sst [smem:[#allocation6_spill]] %s4323_s4  ;;  %s3862_s4 = smov 0  }
   0x6   :  { %4354 = sst [smem:[#allocation7_spill]] %s4324_s5 }
   0x7   :  { %4355 = sst [smem:[#allocation8_spill]] %s4325_s6 }
   0x8   :  { %4356 = sst [smem:[#allocation9_spill]] %s4326_s7 }
   0x9 LB: > { %s3116_s30 = sadd.s32 4294967295, %s3730_s4   ;;  %p3120_p0 = scmp.ge.s32.totalorder %s3730_s4, 1  ;;  %s3730_s4 = sphi %s3862_s4, %s33_s4  }
   0xa   : > { %p647_p1 = scmp.lt.s32.totalorder %s3730_s4, 3 }
   0xc   : > { %p648_p2 = pnand %p3120_p0, %p647_p1 }
   0xd   : > { %s4357_s5 = sld [smem:[#allocation4_spill]] (!%p648_p2)  ;;  %p714_p3 = scmp.lt.s32.totalorder (!%p648_p2), %s3116_s30, 1 }
   0xe   : > { %651 = sbr.rel (%p648_p2) target bundleno = 7698 (0x1e12), region = 112  ;;  %s4358_s2 = sld [smem:[#allocation5_spill]] (!%p648_p2) }
   0xf   : > { %s4359_s29 = sld [smem:[#allocation3_spill]] (!%p648_p2)  ;;  %s3735_s26 = smov (!%p648_p2), 96  }
  0x10   : > { %s4360_s25 = sld [smem:[#allocation2_spill]] (!%p648_p2)  ;;  %s4347_s28 = smov (!%p648_p2), 48  }
  0x11   : > { %s4362_s7 = sld [smem:[#allocation9_spill]] (!%p648_p2)  ;;  %s4367_s0 = smov (!%p648_p2), 16  }
  0x12   : > { %s4363_s24 = sld [smem:[#allocation7_spill]] (!%p648_p2) }
  0x13   : > { %v776_v0 = vld [vmem:[%s4357_s5] sm:$0xf]  ;;  %vm970_vm0 = vcmask 1042432   ;;  %vm971_vm1 = vcmask 1043456   ;;  %v3732_v1 = vmov 65535   ;;  %vm1258_vm2 = vcmask 31744  }
  0x14   : > { %v972_v2 = vsel %vm970_vm0, 4294967295, %v3732_v1  ;;  %v1250_v3 = vld [vmem:[%s4358_s2] sm:$0xf]  ;;  %s4369_s30 = smov (!%p714_p3, %s3116_s30), 1  ;;  %vm897_vm3 = vcmask 56320   ;;  %s4361_s2 = sld [smem:[#allocation6_spill]] }
  0x15   : > { %v973_v4 = vsel %vm971_vm1, %v972_v2, 0  ;;  %3404 = vmatprep.subr.msk.mxu1 %vm971_vm1, %v1250_v3  ;;  %s3565_s6 = smul.u32 192, %s4369_s30  ;;  %s3267_s27 = sshll.u32 %s4369_s30, 4  ;;  %vm1349_vm4 = vcmask 261120   ;;  %vm3734_vm5 = vmmov 0   ;;  %vm1458_vm6 = vcmask 130048  }
  0x16   : > { %v975_v5 = vand.u32 %v973_v4, %v776_v0  ;;  %3405 = vmatpush3.msk.msra.mxu1 %vm971_vm1, %v1250_v3  ;;  %s723_s3 = scalar_lea.vmem %s4359_s29, %s3267_s27  ;;  %s4364_s1 = sld [smem:[#allocation8_spill]]  ;;  %vm1978_vm9 = vcmask 523264   ;;  %vm3055_vm13 = vcmask 311296  }
  0x17   : > { %s3886_s5 = scalar_lea.vmem %s4360_s25, %s3565_s6  ;;  %v1248_v6 = vld [vmem:[%s723_s3] sm:$0xff]  ;;  %v1249_v7 = vld [vmem:[%s723_s3 + $0x8] sm:$0xff]  ;;  %s3737_s6 = smov 112  }
  0x18   : > { %3354 = vmatprep.subr.bf16.mxu0 %v975_v5  ;;  %v3594_v8 = vld [vmem:[%s3886_s5] sm:$0xff]   ;;  %3406 = vmatprep.mubr.msk.f32.mxu1 %vm1258_vm2, %v1248_v6  ;;  %v3595_v9 = vld [vmem:[%s3886_s5 + $0x8] sm:$0xff]   ;;  %v3596_v10 = vld [vmem:[%s3886_s5 + $0x10] sm:$0xff]   ;;  %s4348_s27 = smov 64  }
  0x19   : > { %3355 = vmatpush3.bf16.msra.mxu0 %v975_v5  ;;  %3407 = vmatmul.mubr.msk.f32.vlgmr.msra.gmra.mxu1 %vm1258_vm2, %v1249_v7  ;;  %v3597_v11 = vld [vmem:[%s3886_s5 + $0x18] sm:$0xff]   ;;  %v3598_v12 = vld [vmem:[%s3886_s5 + $0x20] sm:$0xff]   ;;  %v3599_v13 = vld [vmem:[%s3886_s5 + $0x28] sm:$0xff]  }
  0x1a   : > { %3356 = vmatprep.mubr.msk.bf16.mxu0 %vm897_vm3, %v3594_v8  ;;  %v3600_v14 = vld [vmem:[%s3886_s5 + $0x30] sm:$0xff]   ;;  %v3601_v15 = vld [vmem:[%s3886_s5 + $0x38] sm:$0xff]   ;;  %v3602_v16 = vld [vmem:[%s3886_s5 + $0x40] sm:$0xff]  }
  0x1b   : > { %v3603_v17 = vld [vmem:[%s3886_s5 + $0x48] sm:$0xff]   ;;  %v3604_v18 = vld [vmem:[%s3886_s5 + $0x50] sm:$0xff]   ;;  %v3605_v19 = vld [vmem:[%s3886_s5 + $0x58] sm:$0xff]  }
  0x1c   : > { %3357 = vmatmul.mubr.msk.bf16.vlgmr.msra.gmra.mxu0 %vm897_vm3, %v3595_v9  ;;  %v3606_v20 = vld [vmem:[%s3886_s5 + $0x60] sm:$0xff]   ;;  %v3607_v21 = vld [vmem:[%s3886_s5 + $0x68] sm:$0xff]   ;;  %v3608_v22 = vld [vmem:[%s3886_s5 + $0x70] sm:$0xff]  }
  0x1d   : > { %3360 = vmatprep.mubr.msk.bf16.mxu0 %vm897_vm3, %v3596_v10  ;;  %v3609_v23 = vld [vmem:[%s3886_s5 + $0x78] sm:$0xff]   ;;  %v3610_v24 = vld [vmem:[%s3886_s5 + $0x80] sm:$0xff]   ;;  %v3611_v25 = vld [vmem:[%s3886_s5 + $0x88] sm:$0xff]  }
  0x1e   : > { %v3612_v26 = vld [vmem:[%s3886_s5 + $0x90] sm:$0xff]   ;;  %v3613_v27 = vld [vmem:[%s3886_s5 + $0x98] sm:$0xff]   ;;  %v3614_v28 = vld [vmem:[%s3886_s5 + $0xa0] sm:$0xff]  }
  0x1f   : > { %v3615_v29 = vld [vmem:[%s3886_s5 + $0xa8] sm:$0xff]   ;;  %v3616_v30 = vld [vmem:[%s3886_s5 + $0xb0] sm:$0xff]   ;;  %v3617_v31 = vld [vmem:[%s3886_s5 + $0xb8] sm:$0xff]   ;;  %s4346_s5 = smov 16  }
  0x24   : > { %3361 = vmatmul.mubr.msk.bf16.gmra.mxu0 %vm897_vm3, %v3597_v11 }
  0x25   : > { %3364 = vmatprep.mubr.msk.bf16.mxu0 %vm897_vm3, %v3598_v12 }
  0x2c   : > { %3365 = vmatmul.mubr.msk.bf16.gmra.mxu0 %vm897_vm3, %v3599_v13 }
  0x2d   : > { %3368 = vmatprep.mubr.msk.bf16.mxu0 %vm897_vm3, %v3600_v14 }
  0x34   : > { %3369 = vmatmul.mubr.msk.bf16.gmra.mxu0 %vm897_vm3, %v3601_v15 }
  0x35   : > { %3372 = vmatprep.mubr.msk.bf16.mxu0 %vm897_vm3, %v3602_v16 }
  0x3c   : > { %3373 = vmatmul.mubr.msk.bf16.gmra.mxu0 %vm897_vm3, %v3603_v17 }
  0x3d   : > { %3376 = vmatprep.mubr.msk.bf16.mxu0 %vm897_vm3, %v3604_v18 }
  0x44   : > { %3377 = vmatmul.mubr.msk.bf16.gmra.mxu0 %vm897_vm3, %v3605_v19 }
  0x45   : > { %3380 = vmatprep.mubr.msk.bf16.mxu0 %vm897_vm3, %v3606_v20 }
  0x4c   : > { %3381 = vmatmul.mubr.msk.bf16.gmra.mxu0 %vm897_vm3, %v3607_v21 }
  0x4d   : > { %3384 = vmatprep.mubr.msk.bf16.mxu0 %vm897_vm3, %v3608_v22 }
  0x54   : > { %3385 = vmatmul.mubr.msk.bf16.gmra.mxu0 %vm897_vm3, %v3609_v23 }
  0x55   : > { %3388 = vmatprep.mubr.msk.bf16.mxu0 %vm897_vm3, %v3610_v24 }
  0x5c   : > { %3389 = vmatmul.mubr.msk.bf16.gmra.mxu0 %vm897_vm3, %v3611_v25 }
  0x5d   : > { %3392 = vmatprep.mubr.msk.bf16.mxu0 %vm897_vm3, %v3612_v26 }
  0x64   : > { %3393 = vmatmul.mubr.msk.bf16.gmra.mxu0 %vm897_vm3, %v3613_v27 }
  0x65   : > { %3396 = vmatprep.mubr.msk.bf16.mxu0 %vm897_vm3, %v3614_v28 }
  0x6c   : > { %3397 = vmatmul.mubr.msk.bf16.gmra.mxu0 %vm897_vm3, %v3615_v29 }
  0x6d   : > { %3400 = vmatprep.mubr.msk.bf16.mxu0 %vm897_vm3, %v3616_v30 }
  0x74   : > { %3401 = vmatmul.mubr.msk.bf16.gmra.mxu0 %vm897_vm3, %v3617_v31 }
  0xdc   : > { %v3358_v32 = vpop.f32.mrf.mxu0 }
  0xde   : > { %v1011_v33 = vpop.f32.mrf.mxu0 }
  0xdf   : > { %v1202_v34 = vmax.f32 %v1011_v33, %v3358_v32 }
  0xe0   : > { %v3359_v35 = vpop.f32.mrf.mxu0 }
  0xe2   : > { %v1014_v36 = vpop.f32.mrf.mxu0 }
  0xe3   : > { %v1203_v37 = vmax.f32 %v1014_v36, %v3359_v35 }
  0xe4   : > { %v3362_v38 = vpop.f32.mrf.mxu0 }
  0xe6   : > { %v1027_v39 = vpop.f32.mrf.mxu0 }
  0xe7   : > { %v1204_v40 = vmax.f32 %v1027_v39, %v3362_v38 }
  0xe8   : > { %v3363_v41 = vpop.f32.mrf.mxu0 }
  0xe9   : > { %v3938_v42 = vmax.f32 %v1202_v34, %v1204_v40 }
  0xea   : > { %v1030_v43 = vpop.f32.mrf.mxu0 }
  0xeb   : > { %v1205_v44 = vmax.f32 %v1030_v43, %v3363_v41  ;;  %v3408_v41 = vpop.f32.mrf.mxu1 }
  0xec   : > { %v3366_v45 = vpop.f32.mrf.mxu0 }
  0xed   : > { %v3940_v46 = vmax.f32 %v1203_v37, %v1205_v44 }
  0xee   : > { %v1043_v47 = vpop.f32.mrf.mxu0 }
  0xef   : > { %v1206_v48 = vmax.f32 %v1043_v47, %v3366_v45 }
  0xf0   : > { %v3367_v49 = vpop.f32.mrf.mxu0 }
  0xf2   : > { %v1046_v50 = vpop.f32.mrf.mxu0 }
  0xf3   : > { %v1207_v51 = vmax.f32 %v1046_v50, %v3367_v49 }
  0xf4   : > { %v3370_v52 = vpop.f32.mrf.mxu0 }
  0xf6   : > { %v1059_v53 = vpop.f32.mrf.mxu0 }
  0xf7   : > { %v1208_v54 = vmax.f32 %v1059_v53, %v3370_v52  ;;  %v3172_v52 = vld [vmem:[%s4361_s2] ss:$0 sm:$0xff]  ;;  %s3736_s2 = smov 80  }
  0xf8   : > { %v3371_v55 = vpop.f32.mrf.mxu0 }
  0xf9   : > { %v1228_v56 = vmax.f32 %v1206_v48, %v1208_v54 }
  0xfa   : > { %v1062_v57 = vpop.f32.mrf.mxu0 }
  0xfb   : > { %v1238_v58 = vmax.f32 %v3938_v42, %v1228_v56  ;;  %v1209_v59 = vmax.f32 %v1062_v57, %v3371_v55  ;;  %v1334_v55 = vpop.f32.mrf.mxu1 }
  0xfc   : > { %v3374_v60 = vpop.f32.mrf.mxu0 }
  0xfd   : > { %v3943_v61 = vmax.f32 %v1207_v51, %v1209_v59 }
  0xfe   : > { %v1075_v62 = vpop.f32.mrf.mxu0 }
  0xff   : > { %v1239_v63 = vmax.f32 %v3940_v46, %v3943_v61  ;;  %v1210_v28 = vmax.f32 %v1075_v62, %v3374_v60 }
 0x100   : > { %v3375_v0 = vpop.f32.mrf.mxu0 }
 0x102   : > { %v1078_v1 = vpop.f32.mrf.mxu0 }
 0x103   : > { %v1211_v37 = vmax.f32 %v1078_v1, %v3375_v0 }
 0x104   : > { %v3378_v2 = vpop.f32.mrf.mxu0 }
 0x106   : > { %v1091_v3 = vpop.f32.mrf.mxu0 }
 0x107   : > { %v1212_v25 = vmax.f32 %v1091_v3, %v3378_v2  ;;  %v1335_v2 = vadd.f32 %v3172_v52, %v1334_v55 }
 0x108   : > { %v3379_v4 = vpop.f32.mrf.mxu0 }
 0x109   : > { %v1230_v32 = vmax.f32 %v1210_v28, %v1212_v25 }
 0x10a   : > { %v1094_v5 = vpop.f32.mrf.mxu0 }
 0x10b   : > { %v1213_v33 = vmax.f32 %v1094_v5, %v3379_v4 }
 0x10c   : > { %v3382_v6 = vpop.f32.mrf.mxu0 }
 0x10d   : > { %v1231_v45 = vmax.f32 %v1211_v37, %v1213_v33 }
 0x10e   : > { %v1107_v7 = vpop.f32.mrf.mxu0 }
 0x10f   : > { %v1214_v26 = vmax.f32 %v1107_v7, %v3382_v6  ;;  %v1340_v6 = vadd.f32 %v3408_v41, %v3172_v52 }
 0x110   : > { %v3383_v8 = vpop.f32.mrf.mxu0 }
 0x112   : > { %v1110_v9 = vpop.f32.mrf.mxu0 }
 0x113   : > { %v1215_v34 = vmax.f32 %v1110_v9, %v3383_v8 }
 0x114   : > { %v3386_v10 = vpop.f32.mrf.mxu0 }
 0x116   : > { %v1123_v11 = vpop.f32.mrf.mxu0 }
 0x117   : > { %v1216_v23 = vmax.f32 %v1123_v11, %v3386_v10 }
 0x118   : > { %v3387_v12 = vpop.f32.mrf.mxu0 }
 0x119   : > { %v1232_v29 = vmax.f32 %v1214_v26, %v1216_v23 }
 0x11a   : > { %v1126_v13 = vpop.f32.mrf.mxu0 }
 0x11b   : > { %v1217_v30 = vmax.f32 %v1126_v13, %v3387_v12  ;;  %v1240_v38 = vmax.f32 %v1230_v32, %v1232_v29 }
 0x11c   : > { %v3390_v14 = vpop.f32.mrf.mxu0 }
 0x11d   : > { %v1233_v39 = vmax.f32 %v1215_v34, %v1217_v30  ;;  %v1244_v54 = vmax.f32 %v1238_v58, %v1240_v38  ;;  %v3176_v30 = vld [vmem:[%s4363_s24] ss:$0 sm:$0xff] }
 0x11e   : > { %v1139_v15 = vpop.f32.mrf.mxu0  ;;  %v3177_v34 = vld [vmem:[%s4364_s1] ss:$0 sm:$0xff] }
 0x11f   : > { %v1218_v42 = vmax.f32 %v1139_v15, %v3390_v14  ;;  %v1241_v51 = vmax.f32 %v1231_v45, %v1233_v39 }
 0x120   : > { %v3391_v16 = vpop.f32.mrf.mxu0 }
 0x121   : > { %v1245_v3 = vmax.f32 %v1239_v63, %v1241_v51 }
 0x122   : > { %v1142_v17 = vpop.f32.mrf.mxu0 }
 0x123   : > { %v1219_v56 = vmax.f32 %v1142_v17, %v3391_v16 }
 0x124   : > { %v3394_v18 = vpop.f32.mrf.mxu0 }
 0x126   : > { %v1155_v19 = vpop.f32.mrf.mxu0 }
 0x127   : > { %v1220_v36 = vmax.f32 %v1155_v19, %v3394_v18  ;;  %v3618_v19 = vld [vmem:[%s4362_s7 + $0x8] sm:$0xff]  }
 0x128   : > { %v3395_v20 = vpop.f32.mrf.mxu0 }
 0x129   : > { %v1234_v48 = vmax.f32 %v1218_v42, %v1220_v36 }
 0x12a   : > { %v1158_v21 = vpop.f32.mrf.mxu0 }
 0x12b   : > { %v1221_v49 = vmax.f32 %v1158_v21, %v3395_v20  ;;  %v3733_v20 = vmov 0.0   ;;  %v3619_v21 = vld [vmem:[%s4362_s7] sm:$0xff]  }
 0x12c   : > { %v3398_v22 = vpop.f32.mrf.mxu0  ;;  %3409 = vmatprep.subr.bf16.mxu1 %v3733_v20  ;;  %3501 = vmatprep.subr.bf16.mxu0 %v3733_v20 }
 0x12d   : > { %v1235_v62 = vmax.f32 %v1219_v56, %v1221_v49  ;;  %3410 = vmatpush3.bf16.msra.mxu1 %v3618_v19  ;;  %3413 = vmatprep.mubr.msk.bf16.mxu1 %vm3734_vm5, %v3733_v20 }
 0x12e   : > { %v1171_v24 = vpop.f32.mrf.mxu0  ;;  %3411 = vmatprep.subr.bf16.mxu1 %v3733_v20  ;;  %3505 = vmatprep.mubr.msk.bf16.mxu0 %vm3734_vm5, %v3733_v20 }
 0x12f   : > { %v1222_v43 = vmax.f32 %v1171_v24, %v3398_v22 }
 0x130   : > { %v3399_v27 = vpop.f32.mrf.mxu0 }
 0x131   : > { %3412 = vmatpush3.bf16.msra.mxu1 %v3619_v21 }
 0x132   : > { %v1174_v31 = vpop.f32.mrf.mxu0  ;;  %3417 = vmatprep.subr.bf16.mxu1 %v3733_v20 }
 0x133   : > { %v1223_v57 = vmax.f32 %v1174_v31, %v3399_v27 }
 0x134   : > { %v3402_v35 = vpop.f32.mrf.mxu0 }
 0x136   : > { %v1187_v40 = vpop.f32.mrf.mxu0 }
 0x137   : > { %v1224_v44 = vmax.f32 %v1187_v40, %v3402_v35 }
 0x138   : > { %v3403_v47 = vpop.f32.mrf.mxu0 }
 0x139   : > { %v1236_v50 = vmax.f32 %v1222_v43, %v1224_v44 }
 0x13a   : > { %v1190_v53 = vpop.f32.mrf.mxu0 }
 0x13b   : > { %v1242_v59 = vmax.f32 %v1234_v48, %v1236_v50  ;;  %v1225_v60 = vmax.f32 %v1190_v53, %v3403_v47 }
 0x13d   : > { %v1237_v0 = vmax.f32 %v1223_v57, %v1225_v60  ;;  %v1246_v1 = vmax.f32 %v1244_v54, %v1242_v59 }
 0x13f   : > { %v1243_v4 = vmax.f32 %v1235_v62, %v1237_v0  ;;  %v1343_v5 = vadd.f32 %v1335_v2, %v1246_v1 }
 0x141   : > { %v1247_v7 = vmax.f32 %v1245_v3, %v1243_v4  ;;  %v3953_v8 = vmax.f32 %v1343_v5, 0.0 }
 0x143   : > { %v1350_v58 = vsel %vm1349_vm4, %v3953_v8, 0.0  ;;  %v1344_v9 = vadd.f32 %v1340_v6, %v1247_v7 }
 0x144   : > { %1351 = vadd.xlane.f32.xlu0 %v1350_v58 }
 0x145   : > { %v3957_v10 = vmax.f32 %v1344_v9, 0.0 }
 0x147   : > { %v1353_v11 = vsel %vm1349_vm4, %v3957_v10, 0.0 }
 0x148   : > { %1354 = vadd.xlane.f32.xlu0 %v1353_v11 }
 0x1cd   : > { %v1352_v46 = vpop.xlane.xlu0 %1351 }
 0x1ce   : > { %v1357_v61 = vmul.f32 0.03125, %v1352_v46 }
 0x1d0   : > { %v1359_v63 = vsub.f32 %v3953_v8, %v1357_v61 }
 0x1d1   : > { %v1355_v12 = vpop.xlane.xlu0 %1354 }
 0x1d2   : > { %v1358_v13 = vmul.f32 0.03125, %v1355_v12  ;;  %v1361_v14 = vmul.f32 %v1359_v63, %v1359_v63 }
 0x1d4   : > { %v1360_v15 = vsub.f32 %v3957_v10, %v1358_v13  ;;  %v1363_v16 = vsel %vm1349_vm4, %v1361_v14, 0.0 }
 0x1d5   : > { %1364 = vadd.xlane.f32.xlu1 %v1363_v16 }
 0x1d6   : > { %v1362_v17 = vmul.f32 %v1360_v15, %v1360_v15 }
 0x1d8   : > { %v1366_v18 = vsel %vm1349_vm4, %v1362_v17, 0.0 }
 0x1d9   : > { %1367 = vadd.xlane.f32.xlu1 %v1366_v18 }
 0x25e   : > { %v1365_v22 = vpop.xlane.xlu1 %1364 }
 0x25f   : > { %v1369_v23 = vmul.f32 0.03125, %v1365_v22 }
 0x261   : > { %v1371_v24 = vadd.f32 1e-05, %v1369_v23 }
 0x262   : > { %v1368_v25 = vpop.xlane.xlu1 %1367 }
 0x263   : > { %3646 = vrsqrt.f32 %v1371_v24  ;;  %v1370_v26 = vmul.f32 0.03125, %v1368_v25 }
 0x265   : > { %v1372_v27 = vadd.f32 1e-05, %v1370_v26 }
 0x267   : > { %3648 = vrsqrt.f32 %v1372_v27 }
 0x270   : > { %v3647_v28 = vpop.eup %3646 }
 0x271   : > { %v1375_v29 = vmul.f32 %v3647_v28, %v1359_v63 }
 0x273   : > { %v1383_v33 = vmul.f32 %v3176_v30, %v1375_v29 }
 0x274   : > { %v3649_v31 = vpop.eup %3648 }
 0x275   : > { %v1376_v32 = vmul.f32 %v3649_v31, %v1360_v15  ;;  %v1391_v36 = vadd.f32 %v3177_v34, %v1383_v33 }
 0x277   : > { %v1384_v35 = vmul.f32 %v3176_v30, %v1376_v32 }
 0x279   : > { %v1392_v37 = vadd.f32 %v3177_v34, %v1384_v35 }
 0x27b   : > { %v1393_v38 = vpack.c.bf16 %v1392_v37, %v1391_v36 }
 0x27d   : > { %3414 = vmatmul.mubr.msk.bf16.vlgmr.msra.gmra.mxu1 %vm1349_vm4, %v1393_v38 }
 0x27e   : > { %3419 = vmatprep.mubr.msk.bf16.mxu1 %vm3734_vm5, %v3733_v20 }
 0x33d   : > { %v1447_v39 = vpop.f32.mrf.mxu1 }
 0x33f   : > { %v3415_v40 = vpop.f32.mrf.mxu1 }
 0x340   : > { %v3620_v40 = vld [vmem:[%s4327_s8 + $0x8] sm:$0xff]  }
 0x341   : > { %v1450_v41 = vpop.f32.mrf.mxu1 }
 0x342   : > { %v3988_v42 = vpack.c.bf16 %v1450_v41, %v1447_v39  ;;  %v3621_v41 = vld [vmem:[%s4327_s8] sm:$0xff]  }
 0x343   : > { %v3416_v43 = vpop.f32.mrf.mxu1 }
 0x344   : > { %1456 = vrot.lane.b32.xlu0 %v3988_v42, %s3735_s26 }
 0x348   : > { %1578 = vrot.lane.b32.xlu0 %v3988_v42, %s3736_s2 }
 0x34c   : > { %1576 = vrot.lane.b32.xlu0 %v3988_v42, %s3737_s6 }
 0x3b6   : > { %v1457_v44 = vpop.permute.xlu0 %1456 }
 0x3b7   : > { %v1463_v45 = vsel %vm1458_vm6, %v1457_v44, 0 }
 0x3b8   : > { %3418 = vmatpush3.bf16.xpose.msra.mxu1 %v1463_v45 }
 0x3b9   : > { %3423 = vmatprep.subr.bf16.mxu1 %v3733_v20 }
 0x3ba   : > { %v1579_v9 = vpop.permute.xlu0 %1578 }
 0x3bb   : > { %v1584_v46 = vsel %vm1458_vm6, %v1579_v9, 0 }
 0x3be   : > { %v1577_v61 = vpop.permute.xlu0 %1576 }
 0x3bf   : > { %3420 = vmatmul.mubr.msk.bf16.vlgmr.msra.gmra.mxu1 %vm1458_vm6, %v3988_v42 }
 0x3c0   : > { %3425 = vmatprep.mubr.msk.bf16.mxu1 %vm3734_vm5, %v3733_v20 }
 0x47f   : > { %v1499_v47 = vpop.f32.mrf.mxu1 }
 0x480   : > { %v1506_v48 = vsel %vm1458_vm6, %v1499_v47, -inf }
 0x481   : > { %1507 = vmax.xlane.f32.xlu1 %v1506_v48  ;;  %v3421_v49 = vpop.f32.mrf.mxu1 }
 0x483   : > { %v1502_v50 = vpop.f32.mrf.mxu1 }
 0x484   : > { %v1509_v51 = vsel %vm1458_vm6, %v1502_v50, -inf }
 0x485   : > { %1510 = vmax.xlane.f32.xlu1 %v1509_v51  ;;  %v3422_v52 = vpop.f32.mrf.mxu1 }
 0x50a   : > { %v1508_v53 = vpop.xlane.xlu1 %1507 }
 0x50b   : > { %v1512_v54 = vsub.f32 %v1499_v47, %v1508_v53 }
 0x50d   : > { %v1514_v55 = vmul.f32 1.442695, %v1512_v54 }
 0x50e   : > { %v1511_v56 = vpop.xlane.xlu1 %1510 }
 0x50f   : > { %3650 = vpow2.f32 %v1514_v55  ;;  %v1513_v57 = vsub.f32 %v1502_v50, %v1511_v56  ;;  %v3188_v55 = vld [vmem:[%s4328_s9] ss:$0 sm:$0xff] }
 0x511   : > { %v1516_v59 = vmul.f32 1.442695, %v1513_v57 }
 0x513   : > { %3652 = vpow2.f32 %v1516_v59 }
 0x51c   : > { %v3651_v60 = vpop.eup %3650 }
 0x51d   : > { %v1518_v62 = vsel %vm1458_vm6, %v3651_v60, 0.0 }
 0x51e   : > { %1519 = vadd.xlane.f32.xlu1 %v1518_v62 }
 0x520   : > { %v3653_v0 = vpop.eup %3652 }
 0x521   : > { %v1521_v1 = vsel %vm1458_vm6, %v3653_v0, 0.0 }
 0x522   : > { %1522 = vadd.xlane.f32.xlu1 %v1521_v1 }
 0x533   : > { %1529 = vrot.lane.b32.xlu1 %v3988_v42, %s4348_s27 }
 0x5a7   : > { %v1520_v2 = vpop.xlane.xlu1 %1519 }
 0x5a8   : > { %3654 = vrcp.f32 %v1520_v2 }
 0x5ab   : > { %v1523_v3 = vpop.xlane.xlu1 %1522 }
 0x5ac   : > { %3656 = vrcp.f32 %v1523_v3 }
 0x5af   : > { %v1530_v4 = vpop.permute.xlu1 %1529 }
 0x5b0   : > { %3424 = vmatpush3.bf16.msra.mxu1 %v1530_v4 }
 0x5b1   : > { %3429 = vmatprep.subr.bf16.mxu1 %v3733_v20 }
 0x5b5   : > { %v3655_v5 = vpop.eup %3654 }
 0x5b6   : > { %v1526_v7 = vmul.f32 %v3655_v5, %v3651_v60 }
 0x5b9   : > { %v3657_v6 = vpop.eup %3656 }
 0x5ba   : > { %v1527_v58 = vmul.f32 %v3657_v6, %v3653_v0 }
 0x5bc   : > { %v1528_v11 = vpack.c.bf16 %v1527_v58, %v1526_v7 }
 0x5be   : > { %3426 = vmatmul.mubr.msk.bf16.vlgmr.msra.gmra.mxu1 %vm1458_vm6, %v1528_v11 }
 0x5bf   : > { %3430 = vmatpush3.bf16.xpose.msra.mxu1 %v1584_v46  ;;  %3431 = vmatprep.mubr.msk.bf16.mxu1 %vm3734_vm5, %v3733_v20 }
 0x5c0   : > { %3435 = vmatprep.subr.bf16.mxu1 %v3733_v20 }
 0x5c6   : > { %3432 = vmatmul.mubr.msk.bf16.vlgmr.msra.gmra.mxu1 %vm1458_vm6, %v1577_v61  ;;  %v3622_v61 = vld [vmem:[%s4331_s12 + $0x8] sm:$0xff]  }
 0x5c7   : > { %3437 = vmatprep.mubr.msk.bf16.mxu1 %vm3734_vm5, %v3733_v20 }
 0x67e   : > { %v1569_v63 = vpop.f32.mrf.mxu1 }
 0x680   : > { %v3427_v12 = vpop.f32.mrf.mxu1 }
 0x682   : > { %v1572_v13 = vpop.f32.mrf.mxu1 }
 0x684   : > { %v3428_v14 = vpop.f32.mrf.mxu1 }
 0x686   : > { %v1620_v15 = vpop.f32.mrf.mxu1 }
 0x687   : > { %v1627_v16 = vsel %vm1458_vm6, %v1620_v15, -inf }
 0x688   : > { %1628 = vmax.xlane.f32.xlu0 %v1627_v16  ;;  %v3433_v17 = vpop.f32.mrf.mxu1 }
 0x68a   : > { %v1623_v18 = vpop.f32.mrf.mxu1 }
 0x68b   : > { %v1630_v19 = vsel %vm1458_vm6, %v1623_v18, -inf }
 0x68c   : > { %1631 = vmax.xlane.f32.xlu1 %v1630_v19  ;;  %v3434_v21 = vpop.f32.mrf.mxu1 }
 0x68d   : > { %v3189_v21 = vld [vmem:[%s4329_s10] ss:$0 sm:$0xff] }
 0x711   : > { %v1629_v22 = vpop.xlane.xlu0 %1628 }
 0x712   : > { %v1633_v23 = vsub.f32 %v1620_v15, %v1629_v22 }
 0x714   : > { %v1635_v24 = vmul.f32 1.442695, %v1633_v23 }
 0x715   : > { %v1632_v25 = vpop.xlane.xlu1 %1631 }
 0x716   : > { %3658 = vpow2.f32 %v1635_v24  ;;  %v1634_v26 = vsub.f32 %v1623_v18, %v1632_v25  ;;  %v3190_v25 = vld [vmem:[%s4330_s11] ss:$0 sm:$0xff] }
 0x718   : > { %v1637_v27 = vmul.f32 1.442695, %v1634_v26 }
 0x71a   : > { %3660 = vpow2.f32 %v1637_v27 }
 0x723   : > { %v3659_v28 = vpop.eup %3658 }
 0x724   : > { %v1639_v29 = vsel %vm1458_vm6, %v3659_v28, 0.0 }
 0x725   : > { %1640 = vadd.xlane.f32.xlu0 %v1639_v29 }
 0x727   : > { %v3661_v30 = vpop.eup %3660 }
 0x728   : > { %v1642_v31 = vsel %vm1458_vm6, %v3661_v30, 0.0 }
 0x729   : > { %1643 = vadd.xlane.f32.xlu0 %v1642_v31  ;;  %v3625_v31 = vld [vmem:[%s4333_s14 + $0x10] sm:$0xff]  }
 0x73f   : > { %1650 = vrot.lane.b32.xlu0 %v3988_v42, %s4347_s28 }
 0x7ae   : > { %v1641_v32 = vpop.xlane.xlu0 %1640 }
 0x7af   : > { %3662 = vrcp.f32 %v1641_v32  ;;  %v3626_v32 = vld [vmem:[%s4333_s14 + $0x8] sm:$0xff]  }
 0x7b2   : > { %v1644_v33 = vpop.xlane.xlu0 %1643 }
 0x7b3   : > { %3664 = vrcp.f32 %v1644_v33  ;;  %v3627_v33 = vld [vmem:[%s4333_s14] sm:$0xff]  }
 0x7b6   : > { %v1651_v34 = vpop.permute.xlu0 %1650 }
 0x7b7   : > { %3436 = vmatpush3.bf16.msra.mxu1 %v1651_v34  ;;  %v3191_v34 = vld [vmem:[%s4332_s13] ss:$0 sm:$0xff] }
 0x7b8   : > { %3441 = vmatprep.subr.bf16.mxu1 %v3733_v20 }
 0x7bc   : > { %v3663_v35 = vpop.eup %3662 }
 0x7bd   : > { %v1647_v37 = vmul.f32 %v3663_v35, %v3659_v28 }
 0x7c0   : > { %v3665_v36 = vpop.eup %3664 }
 0x7c1   : > { %v1648_v38 = vmul.f32 %v3665_v36, %v3661_v30  ;;  %v3624_v30 = vld [vmem:[%s4333_s14 + $0x18] sm:$0xff]  }
 0x7c3   : > { %v1649_v39 = vpack.c.bf16 %v1648_v38, %v1647_v37 }
 0x7c5   : > { %3438 = vmatmul.mubr.msk.bf16.vlgmr.msra.gmra.mxu1 %vm1458_vm6, %v1649_v39 }
 0x7c6   : > { %3445 = vmatprep.mubr.msk.bf16.mxu1 %vm3734_vm5, %v3733_v20  ;;  %3442 = vmatpush3.bf16.msra.mxu1 %v3620_v40 }
 0x7c7   : > { %3443 = vmatprep.subr.bf16.mxu1 %v3733_v20 }
 0x7ca   : > { %3444 = vmatpush3.bf16.msra.mxu1 %v3621_v41 }
 0x7cb   : > { %3449 = vmatprep.subr.bf16.mxu1 %v3733_v20 }
 0x885   : > { %v1690_v42 = vpop.f32.mrf.mxu1 }
 0x887   : > { %v3439_v43 = vpop.f32.mrf.mxu1 }
 0x889   : > { %v1693_v44 = vpop.f32.mrf.mxu1 }
 0x88a   : > { %v3584_v45 = vpack.i.bf16 %v1693_v44, %v1690_v42 }
 0x88b   : > { %v3440_v47 = vpop.f32.mrf.mxu1 }
 0x88c   : > { %3585 = vrot.lane.b32.xlu1 %v3584_v45, %s4346_s5  ;;  %s726_s5 = scalar_lea.vmem %s4342_s23, %s4369_s30 }
 0x8fe   : > { %v3586_v48 = vpop.permute.xlu1 %3585 }
 0x8ff   : > { %v3588_v49 = vunpack.i.h.bf16 %v3586_v48  ;;  %v3587_v50 = vunpack.i.l.bf16 %v3586_v48 }
 0x901   : > { %v1706_v51 = vsel %vm1458_vm6, %v1572_v13, %v3588_v49  ;;  %v1705_v52 = vsel %vm1458_vm6, %v1569_v63, %v3587_v50  ;;  %v3623_v63 = vld [vmem:[%s4331_s12] sm:$0xff]  }
 0x902   : > { %v1707_v53 = vpack.c.bf16 %v1706_v51, %v1705_v52 }
 0x904   : > { %3446 = vmatmul.mubr.msk.bf16.vlgmr.msra.gmra.mxu1 %vm1349_vm4, %v1707_v53 }
 0x905   : > { %3453 = vmatprep.mubr.msk.bf16.mxu1 %vm3734_vm5, %v3733_v20  ;;  %3450 = vmatpush3.bf16.msra.mxu1 %v3622_v61 }
 0x906   : > { %3451 = vmatprep.subr.bf16.mxu1 %v3733_v20 }
 0x909   : > { %3452 = vmatpush3.bf16.msra.mxu1 %v3623_v63 }
 0x90a   : > { %3457 = vmatprep.subr.bf16.mxu1 %v3733_v20 }
 0x9c4   : > { %v1761_v54 = vpop.f32.mrf.mxu1 }
 0x9c5   : > { %v1768_v56 = vadd.f32 %v1761_v54, %v3953_v8 }
 0x9c6   : > { %v3447_v57 = vpop.f32.mrf.mxu1 }
 0x9c7   : > { %v4045_v59 = vadd.f32 %v3188_v55, %v1768_v56 }
 0x9c8   : > { %v1764_v60 = vpop.f32.mrf.mxu1 }
 0x9c9   : > { %v1769_v62 = vadd.f32 %v1764_v60, %v3957_v10  ;;  %v1781_v0 = vsel %vm1349_vm4, %v4045_v59, 0.0 }
 0x9ca   : > { %1782 = vadd.xlane.f32.xlu1 %v1781_v0  ;;  %v3448_v1 = vpop.f32.mrf.mxu1 }
 0x9cb   : > { %v4050_v2 = vadd.f32 %v3188_v55, %v1769_v62 }
 0x9cd   : > { %v1784_v3 = vsel %vm1349_vm4, %v4050_v2, 0.0 }
 0x9ce   : > { %1785 = vadd.xlane.f32.xlu0 %v1784_v3 }
 0xa53   : > { %v1783_v4 = vpop.xlane.xlu1 %1782 }
 0xa54   : > { %v1787_v5 = vmul.f32 0.03125, %v1783_v4 }
 0xa56   : > { %v1789_v8 = vsub.f32 %v4045_v59, %v1787_v5 }
 0xa57   : > { %v1786_v6 = vpop.xlane.xlu0 %1785 }
 0xa58   : > { %v1788_v7 = vmul.f32 0.03125, %v1786_v6  ;;  %v1791_v58 = vmul.f32 %v1789_v8, %v1789_v8 }
 0xa5a   : > { %v1790_v10 = vsub.f32 %v4050_v2, %v1788_v7  ;;  %v1793_v9 = vsel %vm1349_vm4, %v1791_v58, 0.0 }
 0xa5b   : > { %1794 = vadd.xlane.f32.xlu0 %v1793_v9 }
 0xa5c   : > { %v1792_v11 = vmul.f32 %v1790_v10, %v1790_v10 }
 0xa5e   : > { %v1796_v46 = vsel %vm1349_vm4, %v1792_v11, 0.0 }
 0xa5f   : > { %1797 = vadd.xlane.f32.xlu1 %v1796_v46 }
 0xae4   : > { %v1795_v12 = vpop.xlane.xlu0 %1794 }
 0xae5   : > { %v1799_v13 = vmul.f32 0.03125, %v1795_v12 }
 0xae7   : > { %v1801_v14 = vadd.f32 1e-05, %v1799_v13 }
 0xae8   : > { %v1798_v15 = vpop.xlane.xlu1 %1797 }
 0xae9   : > { %3666 = vrsqrt.f32 %v1801_v14  ;;  %v1800_v16 = vmul.f32 0.03125, %v1798_v15 }
 0xaeb   : > { %v1802_v17 = vadd.f32 1e-05, %v1800_v16 }
 0xaed   : > { %3668 = vrsqrt.f32 %v1802_v17  ;;  %v3741_v17 = vmov -1.0  }
 0xaf6   : > { %v3667_v18 = vpop.eup %3666 }
 0xaf7   : > { %v1805_v19 = vmul.f32 %v3667_v18, %v1789_v8 }
 0xaf9   : > { %v1813_v24 = vmul.f32 %v3189_v21, %v1805_v19 }
 0xafa   : > { %v3669_v22 = vpop.eup %3668 }
 0xafb   : > { %v1806_v23 = vmul.f32 %v3669_v22, %v1790_v10  ;;  %v1821_v27 = vadd.f32 %v3190_v25, %v1813_v24 }
 0xafd   : > { %v1814_v26 = vmul.f32 %v3189_v21, %v1806_v23 }
 0xaff   : > { %v1822_v28 = vadd.f32 %v3190_v25, %v1814_v26 }
 0xb01   : > { %v1823_v29 = vpack.c.bf16 %v1822_v28, %v1821_v27 }
 0xb03   : > { %3454 = vmatmul.mubr.msk.bf16.vlgmr.msra.gmra.mxu1 %vm1349_vm4, %v1823_v29 }
 0xb04   : > { %3465 = vmatprep.mubr.msk.bf16.mxu1 %vm3734_vm5, %v3733_v20  ;;  %3458 = vmatpush3.bf16.msra.mxu1 %v3624_v30 }
 0xb05   : > { %3459 = vmatprep.subr.bf16.mxu1 %v3733_v20 }
 0xb08   : > { %3460 = vmatpush3.bf16.msra.mxu1 %v3625_v31 }
 0xb09   : > { %3461 = vmatprep.subr.bf16.mxu1 %v3733_v20 }
 0xb0c   : > { %3462 = vmatpush3.bf16.msra.mxu1 %v3626_v32 }
 0xb0d   : > { %3463 = vmatprep.subr.bf16.mxu1 %v3733_v20 }
 0xb10   : > { %3464 = vmatpush3.bf16.msra.mxu1 %v3627_v33  ;;  %v3200_v33 = vld [vmem:[%s4334_s15] ss:$0 sm:$0xff] }
 0xb11   : > { %3469 = vmatprep.subr.bf16.mxu1 %v3733_v20 }
 0xbc3   : > { %v1884_v35 = vpop.f32.mrf.mxu1 }
 0xbc4   : > { %v1885_v36 = vadd.f32 %v3191_v34, %v1884_v35 }
 0xbc5   : > { %v3455_v37 = vpop.f32.mrf.mxu1 }
 0xbc6   : > { %v1893_v38 = vmul.f32 0.70710677, %v1885_v36  ;;  %v1891_v26 = vmul.f32 0.5, %v1885_v36 }
 0xbc7   : > { %v1887_v39 = vpop.f32.mrf.mxu1 }
 0xbc8   : > { %v1899_v40 = vand.u32 2147483647, %v1893_v38  ;;  %v1888_v41 = vadd.f32 %v3191_v34, %v1887_v39  ;;  %vm1895_vm7 = vcmp.ge.f32.partialorder %v1893_v38, 0.0 }
 0xbc9   : > { %v3456_v42 = vpop.f32.mrf.mxu1  ;;  %v1897_v18 = vsel %vm1895_vm7, 1.0, %v3741_v17 }
 0xbca   : > { %v1901_v43 = vmul.f32 0.3275911, %v1899_v40  ;;  %v1894_v44 = vmul.f32 0.70710677, %v1888_v41  ;;  %v1927_v50 = vsub.f32 0.0, %v1899_v40  ;;  %v1892_v27 = vmul.f32 0.5, %v1888_v41 }
 0xbcc   : > { %v1903_v45 = vadd.f32 1.0, %v1901_v43  ;;  %v1900_v47 = vand.u32 2147483647, %v1894_v44  ;;  %v1929_v51 = vmul.f32 %v1927_v50, %v1899_v40  ;;  %vm1896_vm8 = vcmp.ge.f32.partialorder %v1894_v44, 0.0 }
 0xbcd   : > { %v1898_v23 = vsel %vm1896_vm8, 1.0, %v3741_v17 }
 0xbce   : > { %3670 = vrcp.f32 %v1903_v45  ;;  %v1902_v48 = vmul.f32 0.3275911, %v1900_v47  ;;  %v1928_v52 = vsub.f32 0.0, %v1900_v47  ;;  %v1931_v55 = vmul.f32 1.442695, %v1929_v51 }
 0xbd0   : > { %v1904_v49 = vadd.f32 1.0, %v1902_v48  ;;  %v1930_v56 = vmul.f32 %v1928_v52, %v1900_v47  ;;  %v3628_v52 = vld [vmem:[%s4362_s7 + $0x18] sm:$0xff]  }
 0xbd2   : > { %3672 = vrcp.f32 %v1904_v49  ;;  %v1933_v1 = vmul.f32 1.442695, %v1930_v56 }
 0xbd3   : > { %3674 = vpow2.f32 %v1931_v55 }
 0xbd4   : > { %3676 = vpow2.f32 %v1933_v1 }
 0xbdb   : > { %v3671_v53 = vpop.eup %3670 }
 0xbdc   : > { %v1909_v54 = vmul.f32 1.0614054, %v3671_v53 }
 0xbde   : > { %v1911_v57 = vadd.f32 -1.4531521, %v1909_v54 }
 0xbdf   : > { %v3673_v60 = vpop.eup %3672 }
 0xbe0   : > { %v1913_v62 = vmul.f32 %v3671_v53, %v1911_v57  ;;  %v1910_v0 = vmul.f32 1.0614054, %v3673_v60  ;;  %v3675_v63 = vpop.eup %3674 }
 0xbe1   : > { %v3677_v16 = vpop.eup %3676 }
 0xbe2   : > { %v1915_v3 = vadd.f32 1.4214138, %v1913_v62  ;;  %v1912_v4 = vadd.f32 -1.4531521, %v1910_v0 }
 0xbe4   : > { %v1917_v5 = vmul.f32 %v3671_v53, %v1915_v3  ;;  %v1914_v8 = vmul.f32 %v3673_v60, %v1912_v4  ;;  %v3203_v3 = vld [vmem:[%s4363_s24 + $0x1] ss:$0 sm:$0xff] }
 0xbe6   : > { %v1919_v6 = vadd.f32 -0.28449672, %v1917_v5  ;;  %v1916_v7 = vadd.f32 1.4214138, %v1914_v8 }
 0xbe8   : > { %v1921_v58 = vmul.f32 %v3671_v53, %v1919_v6  ;;  %v1918_v10 = vmul.f32 %v3673_v60, %v1916_v7  ;;  %v3204_v6 = vld [vmem:[%s4364_s1 + $0x1] ss:$0 sm:$0xff] }
 0xbea   : > { %v1923_v9 = vadd.f32 0.2548296, %v1921_v58  ;;  %v1920_v11 = vadd.f32 -0.28449672, %v1918_v10 }
 0xbec   : > { %v1925_v46 = vmul.f32 %v3671_v53, %v1923_v9  ;;  %v1922_v61 = vmul.f32 %v3673_v60, %v1920_v11  ;;  %v3629_v53 = vld [vmem:[%s4362_s7 + $0x10] sm:$0xff]  }
 0xbee   : > { %v1935_v12 = vmul.f32 %v3675_v63, %v1925_v46  ;;  %v1924_v13 = vadd.f32 0.2548296, %v1922_v61 }
 0xbf0   : > { %v1937_v14 = vsub.f32 1.0, %v1935_v12  ;;  %v1926_v15 = vmul.f32 %v3673_v60, %v1924_v13 }
 0xbf2   : > { %v1939_v19 = vmul.f32 %v1937_v14, %v1897_v18  ;;  %v1936_v21 = vmul.f32 %v3677_v16, %v1926_v15 }
 0xbf4   : > { %v1938_v22 = vsub.f32 1.0, %v1936_v21  ;;  %v1941_v24 = vadd.f32 1.0, %v1939_v19 }
 0xbf6   : > { %v1940_v25 = vmul.f32 %v1938_v22, %v1898_v23  ;;  %v1943_v29 = vmul.f32 %v1941_v24, %v1891_v26 }
 0xbf8   : > { %v1942_v28 = vadd.f32 1.0, %v1940_v25 }
 0xbfa   : > { %v1944_v30 = vmul.f32 %v1942_v28, %v1892_v27 }
 0xbfc   : > { %v1945_v31 = vpack.c.bf16 %v1944_v30, %v1943_v29 }
 0xbfe   : > { %3466 = vmatmul.mubr.msk.bf16.vlgmr.msra.gmra.mxu1 %vm1978_vm9, %v1945_v31 }
 0xbff   : > { %3473 = vmatprep.mubr.msk.bf16.mxu1 %vm3734_vm5, %v3733_v20  ;;  %3470 = vmatpush3.bf16.msra.mxu1 %v3628_v52 }
 0xc00   : > { %3471 = vmatprep.subr.bf16.mxu1 %v3733_v20 }
 0xc03   : > { %3472 = vmatpush3.bf16.msra.mxu1 %v3629_v53 }
 0xc04   : > { %3477 = vmatprep.subr.bf16.mxu1 %v3733_v20 }
 0xcbe   : > { %v2016_v32 = vpop.f32.mrf.mxu1 }
 0xcbf   : > { %v2023_v34 = vadd.f32 %v2016_v32, %v4045_v59 }
 0xcc0   : > { %v3467_v35 = vpop.f32.mrf.mxu1 }
 0xcc1   : > { %v4103_v36 = vadd.f32 %v3200_v33, %v2023_v34 }
 0xcc2   : > { %v2019_v37 = vpop.f32.mrf.mxu1 }
 0xcc3   : > { %v2024_v38 = vadd.f32 %v2019_v37, %v4050_v2  ;;  %v2038_v39 = vsel %vm1349_vm4, %v4103_v36, 0.0 }
 0xcc4   : > { %2039 = vadd.xlane.f32.xlu0 %v2038_v39  ;;  %v3468_v40 = vpop.f32.mrf.mxu1 }
 0xcc5   : > { %v4108_v41 = vadd.f32 %v3200_v33, %v2024_v38 }
 0xcc7   : > { %v2041_v42 = vsel %vm1349_vm4, %v4108_v41, 0.0 }
 0xcc8   : > { %2042 = vadd.xlane.f32.xlu1 %v2041_v42 }
 0xd4d   : > { %v2040_v43 = vpop.xlane.xlu0 %2039 }
 0xd4e   : > { %v2044_v44 = vmul.f32 0.03125, %v2040_v43 }
 0xd50   : > { %v2046_v59 = vsub.f32 %v4103_v36, %v2044_v44 }
 0xd51   : > { %v2043_v45 = vpop.xlane.xlu1 %2042 }
 0xd52   : > { %v2045_v47 = vmul.f32 0.03125, %v2043_v45  ;;  %v2048_v48 = vmul.f32 %v2046_v59, %v2046_v59 }
 0xd54   : > { %v2047_v2 = vsub.f32 %v4108_v41, %v2045_v47  ;;  %v2050_v49 = vsel %vm1349_vm4, %v2048_v48, 0.0 }
 0xd55   : > { %2051 = vadd.xlane.f32.xlu0 %v2050_v49 }
 0xd56   : > { %v2049_v50 = vmul.f32 %v2047_v2, %v2047_v2 }
 0xd58   : > { %v2053_v51 = vsel %vm1349_vm4, %v2049_v50, 0.0 }
 0xd59   : > { %2054 = vadd.xlane.f32.xlu1 %v2053_v51 }
 0xdde   : > { %v2052_v54 = vpop.xlane.xlu0 %2051 }
 0xddf   : > { %v2056_v55 = vmul.f32 0.03125, %v2052_v54 }
 0xde1   : > { %v2058_v56 = vadd.f32 1e-05, %v2056_v55 }
 0xde2   : > { %v2055_v57 = vpop.xlane.xlu1 %2054 }
 0xde3   : > { %3678 = vrsqrt.f32 %v2058_v56  ;;  %v2057_v60 = vmul.f32 0.03125, %v2055_v57 }
 0xde5   : > { %v2059_v62 = vadd.f32 1e-05, %v2057_v60 }
 0xde7   : > { %3680 = vrsqrt.f32 %v2059_v62 }
 0xdf0   : > { %v3679_v0 = vpop.eup %3678 }
 0xdf1   : > { %v2062_v1 = vmul.f32 %v3679_v0, %v2046_v59 }
 0xdf3   : > { %v2070_v8 = vmul.f32 %v3203_v3, %v2062_v1 }
 0xdf4   : > { %v3681_v4 = vpop.eup %3680 }
 0xdf5   : > { %v2063_v5 = vmul.f32 %v3681_v4, %v2047_v2  ;;  %v2078_v58 = vadd.f32 %v3204_v6, %v2070_v8 }
 0xdf7   : > { %v2071_v7 = vmul.f32 %v3203_v3, %v2063_v5 }
 0xdf9   : > { %v2079_v10 = vadd.f32 %v3204_v6, %v2071_v7 }
 0xdfb   : > { %v2080_v9 = vpack.c.bf16 %v2079_v10, %v2078_v58 }
 0xdfd   : > { %3474 = vmatmul.mubr.msk.bf16.vlgmr.msra.gmra.mxu1 %vm1349_vm4, %v2080_v9 }
 0xdfe   : > { %3479 = vmatprep.mubr.msk.bf16.mxu1 %vm3734_vm5, %v3733_v20 }
 0xebd   : > { %v2135_v11 = vpop.f32.mrf.mxu1 }
 0xebf   : > { %v3475_v46 = vpop.f32.mrf.mxu1 }
 0xec1   : > { %v2138_v61 = vpop.f32.mrf.mxu1 }
 0xec2   : > { %v4133_v63 = vpack.c.bf16 %v2138_v61, %v2135_v11  ;;  %v3630_v61 = vld [vmem:[%s4327_s8 + $0x18] sm:$0xff]  }
 0xec3   : > { %v3476_v12 = vpop.f32.mrf.mxu1  ;;  %3502 = vmatpush3.bf16.msra.mxu0 %v3630_v61 }
 0xec4   : > { %2144 = vrot.lane.b32.xlu0 %v4133_v63, %s3735_s26  ;;  %s4365_s26 = smov 64   ;;  %3503 = vmatprep.subr.bf16.mxu0 %v3733_v20 }
 0xec8   : > { %2265 = vrot.lane.b32.xlu0 %v4133_v63, %s3736_s2  ;;  %s4366_s2 = smov 48  }
 0xecc   : > { %2263 = vrot.lane.b32.xlu0 %v4133_v63, %s3737_s6 }
 0xf36   : > { %v2145_v13 = vpop.permute.xlu0 %2144 }
 0xf37   : > { %v2150_v14 = vsel %vm1458_vm6, %v2145_v13, 0 }
 0xf38   : > { %3478 = vmatpush3.bf16.xpose.msra.mxu1 %v2150_v14 }
 0xf39   : > { %3483 = vmatprep.subr.bf16.mxu1 %v3733_v20 }
 0xf3a   : > { %v2266_v42 = vpop.permute.xlu0 %2265 }
 0xf3b   : > { %v2271_v44 = vsel %vm1458_vm6, %v2266_v42, 0 }
 0xf3e   : > { %v2264_v59 = vpop.permute.xlu0 %2263 }
 0xf3f   : > { %3480 = vmatmul.mubr.msk.bf16.vlgmr.msra.gmra.mxu1 %vm1458_vm6, %v4133_v63 }
 0xf40   : > { %3485 = vmatprep.mubr.msk.bf16.mxu1 %vm3734_vm5, %v3733_v20 }
 0xfff   : > { %v2186_v15 = vpop.f32.mrf.mxu1 }
0x1000   : > { %v2193_v16 = vsel %vm1458_vm6, %v2186_v15, -inf }
0x1001   : > { %2194 = vmax.xlane.f32.xlu1 %v2193_v16  ;;  %v3481_v18 = vpop.f32.mrf.mxu1 }
0x1003   : > { %v2189_v19 = vpop.f32.mrf.mxu1 }
0x1004   : > { %v2196_v21 = vsel %vm1458_vm6, %v2189_v19, -inf }
0x1005   : > { %2197 = vmax.xlane.f32.xlu1 %v2196_v21  ;;  %v3482_v22 = vpop.f32.mrf.mxu1 }
0x108a   : > { %v2195_v23 = vpop.xlane.xlu1 %2194 }
0x108b   : > { %v2199_v24 = vsub.f32 %v2186_v15, %v2195_v23 }
0x108d   : > { %v2201_v25 = vmul.f32 1.442695, %v2199_v24 }
0x108e   : > { %v2198_v26 = vpop.xlane.xlu1 %2197 }
0x108f   : > { %3682 = vpow2.f32 %v2201_v25  ;;  %v2200_v27 = vsub.f32 %v2189_v19, %v2198_v26  ;;  %v3224_v26 = vld [vmem:[%s4328_s9 + $0x1] ss:$0 sm:$0xff] }
0x1091   : > { %v2203_v28 = vmul.f32 1.442695, %v2200_v27 }
0x1093   : > { %3684 = vpow2.f32 %v2203_v28 }
0x109c   : > { %v3683_v29 = vpop.eup %3682 }
0x109d   : > { %v2205_v30 = vsel %vm1458_vm6, %v3683_v29, 0.0 }
0x109e   : > { %2206 = vadd.xlane.f32.xlu1 %v2205_v30 }
0x10a0   : > { %v3685_v31 = vpop.eup %3684 }
0x10a1   : > { %v2208_v32 = vsel %vm1458_vm6, %v3685_v31, 0.0 }
0x10a2   : > { %2209 = vadd.xlane.f32.xlu1 %v2208_v32 }
0x10b3   : > { %2216 = vrot.lane.b32.xlu1 %v4133_v63, %s4365_s26 }
0x1127   : > { %v2207_v33 = vpop.xlane.xlu1 %2206 }
0x1128   : > { %3686 = vrcp.f32 %v2207_v33 }
0x112b   : > { %v2210_v34 = vpop.xlane.xlu1 %2209 }
0x112c   : > { %3688 = vrcp.f32 %v2210_v34 }
0x112f   : > { %v2217_v35 = vpop.permute.xlu1 %2216 }
0x1130   : > { %3484 = vmatpush3.bf16.msra.mxu1 %v2217_v35 }
0x1131   : > { %3489 = vmatprep.subr.bf16.mxu1 %v3733_v20 }
0x1135   : > { %v3687_v37 = vpop.eup %3686 }
0x1136   : > { %v2213_v39 = vmul.f32 %v3687_v37, %v3683_v29 }
0x1139   : > { %v3689_v38 = vpop.eup %3688 }
0x113a   : > { %v2214_v40 = vmul.f32 %v3689_v38, %v3685_v31 }
0x113c   : > { %v2215_v43 = vpack.c.bf16 %v2214_v40, %v2213_v39 }
0x113e   : > { %3486 = vmatmul.mubr.msk.bf16.vlgmr.msra.gmra.mxu1 %vm1458_vm6, %v2215_v43 }
0x113f   : > { %3490 = vmatpush3.bf16.xpose.msra.mxu1 %v2271_v44  ;;  %3491 = vmatprep.mubr.msk.bf16.mxu1 %vm3734_vm5, %v3733_v20 }
0x1140   : > { %3495 = vmatprep.subr.bf16.mxu1 %v3733_v20 }
0x1146   : > { %3492 = vmatmul.mubr.msk.bf16.vlgmr.msra.gmra.mxu1 %vm1458_vm6, %v2264_v59 }
0x1147   : > { %3497 = vmatprep.mubr.msk.bf16.mxu1 %vm3734_vm5, %v3733_v20 }
0x11fe   : > { %v2256_v45 = vpop.f32.mrf.mxu1 }
0x1200   : > { %v3487_v47 = vpop.f32.mrf.mxu1 }
0x1201   : > { %v3633_v47 = vld [vmem:[%s4331_s12 + $0x10] sm:$0xff]  }
0x1202   : > { %v2259_v48 = vpop.f32.mrf.mxu1 }
0x1204   : > { %v3488_v2 = vpop.f32.mrf.mxu1 }
0x1206   : > { %v2307_v49 = vpop.f32.mrf.mxu1 }
0x1207   : > { %v2314_v50 = vsel %vm1458_vm6, %v2307_v49, -inf }
0x1208   : > { %2315 = vmax.xlane.f32.xlu0 %v2314_v50  ;;  %v3493_v51 = vpop.f32.mrf.mxu1 }
0x120a   : > { %v2310_v52 = vpop.f32.mrf.mxu1 }
0x120b   : > { %v2317_v53 = vsel %vm1458_vm6, %v2310_v52, -inf }
0x120c   : > { %2318 = vmax.xlane.f32.xlu1 %v2317_v53  ;;  %v3494_v54 = vpop.f32.mrf.mxu1 }
0x1291   : > { %v2316_v55 = vpop.xlane.xlu0 %2315 }
0x1292   : > { %v2320_v56 = vsub.f32 %v2307_v49, %v2316_v55  ;;  %v3227_v55 = vld [vmem:[%s4329_s10 + $0x1] ss:$0 sm:$0xff] }
0x1294   : > { %v2322_v57 = vmul.f32 1.442695, %v2320_v56 }
0x1295   : > { %v2319_v60 = vpop.xlane.xlu1 %2318 }
0x1296   : > { %3690 = vpow2.f32 %v2322_v57  ;;  %v2321_v62 = vsub.f32 %v2310_v52, %v2319_v60 }
0x1298   : > { %v2324_v0 = vmul.f32 1.442695, %v2321_v62  ;;  %v3228_v62 = vld [vmem:[%s4330_s11 + $0x1] ss:$0 sm:$0xff] }
0x129a   : > { %3692 = vpow2.f32 %v2324_v0 }
0x12a3   : > { %v3691_v1 = vpop.eup %3690 }
0x12a4   : > { %v2326_v3 = vsel %vm1458_vm6, %v3691_v1, 0.0 }
0x12a5   : > { %2327 = vadd.xlane.f32.xlu0 %v2326_v3 }
0x12a7   : > { %v3693_v4 = vpop.eup %3692 }
0x12a8   : > { %v2329_v5 = vsel %vm1458_vm6, %v3693_v4, 0.0 }
0x12a9   : > { %2330 = vadd.xlane.f32.xlu0 %v2329_v5  ;;  %v3634_v5 = vld [vmem:[%s4333_s14 + $0x38] sm:$0xff]  }
0x12bf   : > { %2337 = vrot.lane.b32.xlu0 %v4133_v63, %s4366_s2  ;;  %v3631_v63 = vld [vmem:[%s4327_s8 + $0x10] sm:$0xff]  }
0x12c0   : > { %3504 = vmatpush3.bf16.msra.mxu0 %v3631_v63 }
0x12c1   : > { %3517 = vmatprep.subr.bf16.mxu0 %v3733_v20 }
0x132e   : > { %v2328_v8 = vpop.xlane.xlu0 %2327 }
0x132f   : > { %3694 = vrcp.f32 %v2328_v8  ;;  %v3635_v8 = vld [vmem:[%s4333_s14 + $0x30] sm:$0xff]  }
0x1332   : > { %v2331_v6 = vpop.xlane.xlu0 %2330 }
0x1333   : > { %3696 = vrcp.f32 %v2331_v6  ;;  %v3636_v6 = vld [vmem:[%s4333_s14 + $0x28] sm:$0xff]  }
0x1336   : > { %v2338_v7 = vpop.permute.xlu0 %2337 }
0x1337   : > { %3496 = vmatpush3.bf16.msra.mxu1 %v2338_v7  ;;  %v3637_v7 = vld [vmem:[%s4333_s14 + $0x20] sm:$0xff]  }
0x1338   : > { %3509 = vmatprep.subr.bf16.mxu1 %v3733_v20 }
0x133c   : > { %v3695_v58 = vpop.eup %3694 }
0x133d   : > { %v2334_v9 = vmul.f32 %v3695_v58, %v3691_v1  ;;  %v3234_v58 = vld [vmem:[%s4332_s13 + $0x1] ss:$0 sm:$0xff] }
0x1340   : > { %v3697_v10 = vpop.eup %3696 }
0x1341   : > { %v2335_v11 = vmul.f32 %v3697_v10, %v3693_v4 }
0x1343   : > { %v2336_v46 = vpack.c.bf16 %v2335_v11, %v2334_v9 }
0x1345   : > { %3498 = vmatmul.mubr.msk.bf16.vlgmr.msra.gmra.mxu1 %vm1458_vm6, %v2336_v46 }
0x1346   : > { %3513 = vmatprep.mubr.msk.bf16.mxu1 %vm3734_vm5, %v3733_v20 }
0x1405   : > { %v2377_v12 = vpop.f32.mrf.mxu1 }
0x1407   : > { %v3499_v13 = vpop.f32.mrf.mxu1 }
0x1409   : > { %v2380_v14 = vpop.f32.mrf.mxu1 }
0x140a   : > { %v3589_v15 = vpack.i.bf16 %v2380_v14, %v2377_v12 }
0x140b   : > { %v3500_v16 = vpop.f32.mrf.mxu1 }
0x140c   : > { %3590 = vrot.lane.b32.xlu1 %v3589_v15, %s4367_s0 }
0x147e   : > { %v3591_v18 = vpop.permute.xlu1 %3590 }
0x147f   : > { %v3593_v19 = vunpack.i.h.bf16 %v3591_v18  ;;  %v3592_v21 = vunpack.i.l.bf16 %v3591_v18 }
0x1481   : > { %v2393_v22 = vsel %vm1458_vm6, %v2259_v48, %v3593_v19  ;;  %v2392_v23 = vsel %vm1458_vm6, %v2256_v45, %v3592_v21  ;;  %v3632_v45 = vld [vmem:[%s4331_s12 + $0x18] sm:$0xff]  }
0x1482   : > { %v2394_v24 = vpack.c.bf16 %v2393_v22, %v2392_v23  ;;  %3510 = vmatpush3.bf16.msra.mxu1 %v3632_v45 }
0x1483   : > { %3511 = vmatprep.subr.bf16.mxu1 %v3733_v20 }
0x1484   : > { %3506 = vmatmul.mubr.msk.bf16.vlgmr.msra.gmra.mxu0 %vm1349_vm4, %v2394_v24 }
0x1485   : > { %3525 = vmatprep.mubr.msk.bf16.mxu0 %vm3734_vm5, %v3733_v20  ;;  %3518 = vmatpush3.bf16.msra.mxu0 %v3634_v5 }
0x1486   : > { %3512 = vmatpush3.bf16.msra.mxu1 %v3633_v47  ;;  %3519 = vmatprep.subr.bf16.mxu0 %v3733_v20 }
0x1487   : > { %3529 = vmatprep.subr.bf16.mxu1 %v3733_v20 }
0x1489   : > { %3520 = vmatpush3.bf16.msra.mxu0 %v3635_v8 }
0x148a   : > { %3521 = vmatprep.subr.bf16.mxu0 %v3733_v20 }
0x148d   : > { %3522 = vmatpush3.bf16.msra.mxu0 %v3636_v6  ;;  %v3638_v6 = vld [vmem:[%s4335_s16 + $0x8] sm:$0xff]  }
0x148e   : > { %3523 = vmatprep.subr.bf16.mxu0 %v3733_v20 }
0x1491   : > { %3524 = vmatpush3.bf16.msra.mxu0 %v3637_v7  ;;  %v3639_v7 = vld [vmem:[%s4335_s16] sm:$0xff]  }
0x1492   : > { %3545 = vmatprep.subr.bf16.mxu0 %v3733_v20 }
0x1544   : > { %v2449_v25 = vpop.f32.mrf.mxu0 }
0x1545   : > { %v2456_v27 = vadd.f32 %v2449_v25, %v4103_v36 }
0x1546   : > { %v3507_v28 = vpop.f32.mrf.mxu0 }
0x1547   : > { %v4190_v29 = vadd.f32 %v3224_v26, %v2456_v27 }
0x1548   : > { %v2452_v30 = vpop.f32.mrf.mxu0 }
0x1549   : > { %v2457_v31 = vadd.f32 %v2452_v30, %v4108_v41  ;;  %v2472_v32 = vsel %vm1349_vm4, %v4190_v29, 0.0 }
0x154a   : > { %2473 = vadd.xlane.f32.xlu1 %v2472_v32  ;;  %v3508_v33 = vpop.f32.mrf.mxu0 }
0x154b   : > { %v4195_v34 = vadd.f32 %v3224_v26, %v2457_v31 }
0x154d   : > { %v2475_v35 = vsel %vm1349_vm4, %v4195_v34, 0.0 }
0x154e   : > { %2476 = vadd.xlane.f32.xlu0 %v2475_v35 }
0x15d3   : > { %v2474_v37 = vpop.xlane.xlu1 %2473 }
0x15d4   : > { %v2478_v38 = vmul.f32 0.03125, %v2474_v37 }
0x15d6   : > { %v2480_v36 = vsub.f32 %v4190_v29, %v2478_v38 }
0x15d7   : > { %v2477_v39 = vpop.xlane.xlu0 %2476 }
0x15d8   : > { %v2479_v40 = vmul.f32 0.03125, %v2477_v39  ;;  %v2482_v42 = vmul.f32 %v2480_v36, %v2480_v36 }
0x15da   : > { %v2481_v41 = vsub.f32 %v4195_v34, %v2479_v40  ;;  %v2484_v43 = vsel %vm1349_vm4, %v2482_v42, 0.0 }
0x15db   : > { %2485 = vadd.xlane.f32.xlu0 %v2484_v43 }
0x15dc   : > { %v2483_v44 = vmul.f32 %v2481_v41, %v2481_v41 }
0x15de   : > { %v2487_v59 = vsel %vm1349_vm4, %v2483_v44, 0.0 }
0x15df   : > { %2488 = vadd.xlane.f32.xlu1 %v2487_v59 }
0x1664   : > { %v2486_v48 = vpop.xlane.xlu0 %2485 }
0x1665   : > { %v2490_v2 = vmul.f32 0.03125, %v2486_v48 }
0x1667   : > { %v2492_v49 = vadd.f32 1e-05, %v2490_v2 }
0x1668   : > { %v2489_v50 = vpop.xlane.xlu1 %2488 }
0x1669   : > { %3698 = vrsqrt.f32 %v2492_v49  ;;  %v2491_v51 = vmul.f32 0.03125, %v2489_v50 }
0x166b   : > { %v2493_v52 = vadd.f32 1e-05, %v2491_v51 }
0x166d   : > { %3700 = vrsqrt.f32 %v2493_v52 }
0x1676   : > { %v3699_v53 = vpop.eup %3698 }
0x1677   : > { %v2496_v54 = vmul.f32 %v3699_v53, %v2480_v36 }
0x1679   : > { %v2504_v60 = vmul.f32 %v3227_v55, %v2496_v54 }
0x167a   : > { %v3701_v56 = vpop.eup %3700 }
0x167b   : > { %v2497_v57 = vmul.f32 %v3701_v56, %v2481_v41  ;;  %v2512_v1 = vadd.f32 %v3228_v62, %v2504_v60 }
0x167d   : > { %v2505_v0 = vmul.f32 %v3227_v55, %v2497_v57 }
0x167f   : > { %v2513_v3 = vadd.f32 %v3228_v62, %v2505_v0 }
0x1681   : > { %v2514_v4 = vpack.c.bf16 %v2513_v3, %v2512_v1 }
0x1683   : > { %3514 = vmatmul.mubr.msk.bf16.vlgmr.msra.gmra.mxu1 %vm1349_vm4, %v2514_v4 }
0x1684   : > { %3533 = vmatprep.mubr.msk.bf16.mxu1 %vm3734_vm5, %v3733_v20  ;;  %3530 = vmatpush3.bf16.msra.mxu1 %v3638_v6 }
0x1685   : > { %3531 = vmatprep.subr.bf16.mxu1 %v3733_v20 }
0x1688   : > { %3532 = vmatpush3.bf16.msra.mxu1 %v3639_v7 }
0x1689   : > { %3537 = vmatprep.subr.bf16.mxu1 %v3733_v20 }
0x1743   : > { %v2577_v10 = vpop.f32.mrf.mxu1 }
0x1744   : > { %v2578_v9 = vadd.f32 %v3234_v58, %v2577_v10 }
0x1745   : > { %v3515_v11 = vpop.f32.mrf.mxu1 }
0x1746   : > { %v2586_v46 = vmul.f32 0.70710677, %v2578_v9  ;;  %v2584_v0 = vmul.f32 0.5, %v2578_v9  ;;  %v3252_v11 = vld [vmem:[%s4334_s15 + $0x1] ss:$0 sm:$0xff] }
0x1747   : > { %v2580_v61 = vpop.f32.mrf.mxu1 }
0x1748   : > { %v2592_v63 = vand.u32 2147483647, %v2586_v46  ;;  %v2581_v12 = vadd.f32 %v3234_v58, %v2580_v61  ;;  %vm2588_vm10 = vcmp.ge.f32.partialorder %v2586_v46, 0.0 }
0x1749   : > { %v3516_v13 = vpop.f32.mrf.mxu1  ;;  %v2590_v53 = vsel %vm2588_vm10, 1.0, %v3741_v17 }
0x174a   : > { %v2594_v14 = vmul.f32 0.3275911, %v2592_v63  ;;  %v2587_v15 = vmul.f32 0.70710677, %v2581_v12  ;;  %v2620_v22 = vsub.f32 0.0, %v2592_v63  ;;  %v2585_v1 = vmul.f32 0.5, %v2581_v12 }
0x174c   : > { %v2596_v16 = vadd.f32 1.0, %v2594_v14  ;;  %v2593_v18 = vand.u32 2147483647, %v2587_v15  ;;  %v2622_v23 = vmul.f32 %v2620_v22, %v2592_v63  ;;  %vm2589_vm11 = vcmp.ge.f32.partialorder %v2587_v15, 0.0 }
0x174d   : > { %v2591_v57 = vsel %vm2589_vm11, 1.0, %v3741_v17 }
0x174e   : > { %3702 = vrcp.f32 %v2596_v16  ;;  %v2595_v19 = vmul.f32 0.3275911, %v2593_v18  ;;  %v2621_v24 = vsub.f32 0.0, %v2593_v18  ;;  %v2624_v27 = vmul.f32 1.442695, %v2622_v23 }
0x1750   : > { %v2597_v21 = vadd.f32 1.0, %v2595_v19  ;;  %v2623_v28 = vmul.f32 %v2621_v24, %v2593_v18 }
0x1752   : > { %3704 = vrcp.f32 %v2597_v21  ;;  %v2626_v35 = vmul.f32 1.442695, %v2623_v28 }
0x1753   : > { %3706 = vpow2.f32 %v2624_v27 }
0x1754   : > { %3708 = vpow2.f32 %v2626_v35  ;;  %v2821_v35 = vsel %vm1978_vm9, %v3638_v6, 0 }
0x175b   : > { %v3703_v25 = vpop.eup %3702 }
0x175c   : > { %v2602_v26 = vmul.f32 1.0614054, %v3703_v25 }
0x175e   : > { %v2604_v30 = vadd.f32 -1.4531521, %v2602_v26 }
0x175f   : > { %v3705_v31 = vpop.eup %3704 }
0x1760   : > { %v2606_v32 = vmul.f32 %v3703_v25, %v2604_v30  ;;  %v2603_v33 = vmul.f32 1.0614054, %v3705_v31  ;;  %v3707_v48 = vpop.eup %3706 }
0x1761   : > { %v3709_v52 = vpop.eup %3708 }
0x1762   : > { %v2608_v37 = vadd.f32 1.4214138, %v2606_v32  ;;  %v2605_v38 = vadd.f32 -1.4531521, %v2603_v33 }
0x1764   : > { %v2610_v36 = vmul.f32 %v3703_v25, %v2608_v37  ;;  %v2607_v39 = vmul.f32 %v3705_v31, %v2605_v38  ;;  %v2818_v37 = vsel %vm1978_vm9, %v3639_v7, 0 }
0x1766   : > { %v2612_v40 = vadd.f32 -0.28449672, %v2610_v36  ;;  %v2609_v42 = vadd.f32 1.4214138, %v2607_v39 }
0x1768   : > { %v2614_v41 = vmul.f32 %v3703_v25, %v2612_v40  ;;  %v2611_v43 = vmul.f32 %v3705_v31, %v2609_v42 }
0x176a   : > { %v2616_v44 = vadd.f32 0.2548296, %v2614_v41  ;;  %v2613_v59 = vadd.f32 -0.28449672, %v2611_v43 }
0x176c   : > { %v2618_v45 = vmul.f32 %v3703_v25, %v2616_v44  ;;  %v2615_v47 = vmul.f32 %v3705_v31, %v2613_v59 }
0x176e   : > { %v2628_v2 = vmul.f32 %v3707_v48, %v2618_v45  ;;  %v2617_v49 = vadd.f32 0.2548296, %v2615_v47 }
0x1770   : > { %v2630_v50 = vsub.f32 1.0, %v2628_v2  ;;  %v2619_v51 = vmul.f32 %v3705_v31, %v2617_v49 }
0x1772   : > { %v2632_v54 = vmul.f32 %v2630_v50, %v2590_v53  ;;  %v2629_v55 = vmul.f32 %v3709_v52, %v2619_v51 }
0x1774   : > { %v2631_v56 = vsub.f32 1.0, %v2629_v55  ;;  %v2634_v60 = vadd.f32 1.0, %v2632_v54 }
0x1776   : > { %v2633_v62 = vmul.f32 %v2631_v56, %v2591_v57  ;;  %v2636_v4 = vmul.f32 %v2634_v60, %v2584_v0 }
0x1778   : > { %v2635_v3 = vadd.f32 1.0, %v2633_v62 }
0x177a   : > { %v2637_v5 = vmul.f32 %v2635_v3, %v2585_v1  ;;  %v3640_v3 = vld [vmem:[%s4338_s19 + $0x8] sm:$0xff]  }
0x177c   : > { %v2638_v8 = vpack.c.bf16 %v2637_v5, %v2636_v4  ;;  %v3641_v4 = vld [vmem:[%s4338_s19] sm:$0xff]  }
0x177e   : > { %3526 = vmatmul.mubr.msk.bf16.vlgmr.msra.gmra.mxu0 %vm1978_vm9, %v2638_v8 }
0x177f   : > { %3549 = vmatprep.mubr.msk.bf16.mxu0 %vm3734_vm5, %v3733_v20  ;;  %3546 = vmatpush3.bf16.msra.mxu0 %v3640_v3 }
0x1780   : > { %3547 = vmatprep.subr.bf16.mxu0 %v3733_v20 }
0x1783   : > { %3548 = vmatpush3.bf16.msra.mxu0 %v3641_v4 }
0x1784   : > { %3553 = vmatprep.subr.bf16.mxu0 %v3733_v20 }
0x183e   : > { %v2709_v58 = vpop.f32.mrf.mxu0 }
0x183f   : > { %v2716_v9 = vadd.f32 %v2709_v58, %v4190_v29  ;;  %v2873_v58 = vld [vmem:[%s4336_s17] sm:$0x1] }
0x1840   : > { %v3527_v10 = vpop.f32.mrf.mxu0 }
0x1841   : > { %v2726_v12 = vadd.f32 %v3252_v11, %v2716_v9  ;;  %v2874_v9 = vld [vmem:[%s4337_s18] sm:$0x1] }
0x1842   : > { %v2712_v46 = vpop.f32.mrf.mxu0 }
0x1843   : > { %v2717_v61 = vadd.f32 %v2712_v46, %v4195_v34 }
0x1844   : > { %v3528_v63 = vpop.f32.mrf.mxu0 }
0x1845   : > { %v2727_v13 = vadd.f32 %v3252_v11, %v2717_v61  ;;  %v3642_v63 = vld [vmem:[%s4340_s21 + $0x18] sm:$0xff]  }
0x1847   : > { %v2728_v14 = vpack.c.bf16 %v2727_v13, %v2726_v12  ;;  %v3643_v12 = vld [vmem:[%s4340_s21 + $0x10] sm:$0xff]   ;;  %v3644_v13 = vld [vmem:[%s4340_s21 + $0x8] sm:$0xff]  }
0x1849   : > { %3534 = vmatmul.mubr.msk.bf16.vlgmr.msra.gmra.mxu1 %vm1349_vm4, %v2728_v14  ;;  %v3645_v14 = vld [vmem:[%s4340_s21] sm:$0xff]  }
0x184a   : > { %3541 = vmatprep.mubr.msk.bf16.mxu1 %vm3734_vm5, %v3733_v20  ;;  %3538 = vmatpush3.bf16.xpose.msra.mxu1 %v2821_v35 }
0x184b   : > { %3539 = vmatprep.subr.bf16.mxu1 %v3733_v20 }
0x1852   : > { %3540 = vmatpush3.bf16.xpose.msra.mxu1 %v2818_v37 }
0x1909   : > { %v2782_v15 = vpop.f32.mrf.mxu1 }
0x190a   : > { %v2789_v16 = vmul.f32 0.17677669, %v2782_v15  ;;  %v2895_v15 = vld [vmem:[%s4339_s20] sm:$0x1] }
0x190b   : > { %v3535_v18 = vpop.f32.mrf.mxu1 }
0x190c   : > { %v2791_v29 = vsel %vm1978_vm9, %v2789_v16, -inf }
0x190d   : > { %2792 = vmax.xlane.f32.xlu0 %v2791_v29  ;;  %v2785_v19 = vpop.f32.mrf.mxu1 }
0x190e   : > { %v2790_v21 = vmul.f32 0.17677669, %v2785_v19 }
0x190f   : > { %v3536_v22 = vpop.f32.mrf.mxu1 }
0x1910   : > { %v2794_v34 = vsel %vm1978_vm9, %v2790_v21, -inf }
0x1911   : > { %2795 = vmax.xlane.f32.xlu1 %v2794_v34 }
0x1996   : > { %v2793_v23 = vpop.xlane.xlu0 %2792 }
0x1997   : > { %v2797_v24 = vsub.f32 %v2789_v16, %v2793_v23 }
0x1999   : > { %v2799_v25 = vmul.f32 1.442695, %v2797_v24 }
0x199a   : > { %v2796_v26 = vpop.xlane.xlu1 %2795 }
0x199b   : > { %3710 = vpow2.f32 %v2799_v25  ;;  %v2798_v27 = vsub.f32 %v2790_v21, %v2796_v26 }
0x199d   : > { %v2801_v28 = vmul.f32 1.442695, %v2798_v27 }
0x199f   : > { %3712 = vpow2.f32 %v2801_v28 }
0x19a8   : > { %v3711_v30 = vpop.eup %3710 }
0x19a9   : > { %v2803_v31 = vsel %vm1978_vm9, %v3711_v30, 0.0 }
0x19aa   : > { %2804 = vadd.xlane.f32.xlu0 %v2803_v31 }
0x19ac   : > { %v3713_v32 = vpop.eup %3712 }
0x19ad   : > { %v2806_v33 = vsel %vm1978_vm9, %v3713_v32, 0.0 }
0x19ae   : > { %2807 = vadd.xlane.f32.xlu1 %v2806_v33 }
0x1a33   : > { %v2805_v38 = vpop.xlane.xlu0 %2804 }
0x1a34   : > { %3714 = vrcp.f32 %v2805_v38 }
0x1a37   : > { %v2808_v36 = vpop.xlane.xlu1 %2807 }
0x1a38   : > { %3716 = vrcp.f32 %v2808_v36 }
0x1a41   : > { %v3715_v39 = vpop.eup %3714 }
0x1a42   : > { %v2811_v42 = vmul.f32 %v3715_v39, %v3711_v30 }
0x1a45   : > { %v3717_v40 = vpop.eup %3716 }
0x1a46   : > { %v2812_v41 = vmul.f32 %v3717_v40, %v3713_v32 }
0x1a48   : > { %v2813_v43 = vpack.c.bf16 %v2812_v41, %v2811_v42 }
0x1a4a   : > { %3542 = vmatmul.mubr.msk.bf16.vlgmr.msra.gmra.mxu1 %vm1978_vm9, %v2813_v43 }
0x1b0a   : > { %v2857_v44 = vpop.f32.mrf.mxu1 }
0x1b0b   : > { %v2864_v47 = vsel %vm1349_vm4, %v2857_v44, -inf }
0x1b0c   : > { %v3543_v59 = vpop.f32.mrf.mxu1 }
0x1b0e   : > { %v2860_v45 = vpop.f32.mrf.mxu1 }
0x1b0f   : > { %v2865_v48 = vsel %vm1349_vm4, %v2860_v45, -inf }
0x1b10   : > { %v2866_v2 = vmax.f32 %v2864_v47, %v2865_v48  ;;  %v3544_v49 = vpop.f32.mrf.mxu1  ;;  %v2987_v48 = vld [vmem:[%s4341_s22] sm:$0x1] }
0x1b12   : > { %v2867_v50 = vrot.slane %v2866_v2, 4 }
0x1b14   : > { %v2868_v51 = vmax.f32 %v2866_v2, %v2867_v50 }
0x1b16   : > { %v2869_v52 = vrot.slane %v2868_v51, 2 }
0x1b18   : > { %v2870_v53 = vmax.f32 %v2868_v51, %v2869_v52 }
0x1b1a   : > { %v2871_v54 = vrot.slane %v2870_v53, 1 }
0x1b1c   : > { %v2872_v55 = vmax.f32 %v2870_v53, %v2871_v54 }
0x1b1e   : > { %v2875_v56 = vsel %vm1349_vm4, %v2872_v55, 0.0 }
0x1b1f   : > { %2876 = vadd.xlane.f32.xlu0 %v2875_v56 }
0x1ba8   : > { %v2877_v57 = vpop.xlane.xlu0 %2876 }
0x1ba9   : > { %v2878_v60 = vmul.f32 0.03125, %v2877_v57 }
0x1bab   : > { %v2879_v62 = vsub.f32 %v2872_v55, %v2878_v60 }
0x1bad   : > { %v2880_v0 = vmul.f32 %v2879_v62, %v2879_v62 }
0x1baf   : > { %v2881_v1 = vsel %vm1349_vm4, %v2880_v0, 0.0 }
0x1bb0   : > { %2882 = vadd.xlane.f32.xlu1 %v2881_v1 }
0x1c39   : > { %v2883_v5 = vpop.xlane.xlu1 %2882 }
0x1c3a   : > { %v2884_v8 = vmul.f32 0.03125, %v2883_v5 }
0x1c3c   : > { %v2885_v6 = vadd.f32 1e-05, %v2884_v8 }
0x1c3e   : > { %3718 = vrsqrt.f32 %v2885_v6 }
0x1c4b   : > { %v3719_v7 = vpop.eup %3718 }
0x1c4c   : > { %v2887_v10 = vmul.f32 %v3719_v7, %v2879_v62 }
0x1c4e   : > { %v2888_v11 = vmul.f32 %v2887_v10, %v2873_v58 }
0x1c50   : > { %v2889_v46 = vadd.f32 %v2888_v11, %v2874_v9 }
0x1c52   : > { %v2890_v61 = vpack.c.bf16 %v2889_v46, %v2889_v46 }
0x1c54   : > { %3550 = vmatmul.mubr.msk.bf16.vlgmr.msra.gmra.mxu0 %vm1349_vm4, %v2890_v61 }
0x1c55   : > { %3561 = vmatprep.mubr.msk.bf16.mxu0 %vm3734_vm5, %v3733_v20  ;;  %3554 = vmatpush3.bf16.msra.mxu0 %v3642_v63 }
0x1c56   : > { %3555 = vmatprep.subr.bf16.mxu0 %v3733_v20 }
0x1c59   : > { %3556 = vmatpush3.bf16.msra.mxu0 %v3643_v12 }
0x1c5a   : > { %3557 = vmatprep.subr.bf16.mxu0 %v3733_v20 }
0x1c5d   : > { %3558 = vmatpush3.bf16.msra.mxu0 %v3644_v13 }
0x1c5e   : > { %3559 = vmatprep.subr.bf16.mxu0 %v3733_v20 }
0x1c61   : > { %3560 = vmatpush3.bf16.msra.mxu0 %v3645_v14 }
0x1d14   : > { %v2945_v16 = vpop.f32.mrf.mxu0 }
0x1d15   : > { %v2946_v18 = vadd.f32 %v2945_v16, %v2895_v15 }
0x1d16   : > { %v3551_v29 = vpop.f32.mrf.mxu0 }
0x1d17   : > { %v2952_v19 = vmul.f32 0.70710677, %v2946_v18  ;;  %v2951_v44 = vmul.f32 0.5, %v2946_v18 }
0x1d18   : > { %v2948_v21 = vpop.f32.mrf.mxu0 }
0x1d19   : > { %v2955_v22 = vand.u32 2147483647, %v2952_v19  ;;  %vm2953_vm12 = vcmp.ge.f32.partialorder %v2952_v19, 0.0 }
0x1d1a   : > { %v3552_v34 = vpop.f32.mrf.mxu0  ;;  %v2954_v41 = vsel %vm2953_vm12, 1.0, %v3741_v17 }
0x1d1b   : > { %v2956_v23 = vmul.f32 0.3275911, %v2955_v22  ;;  %v2969_v20 = vsub.f32 0.0, %v2955_v22 }
0x1d1d   : > { %v2957_v24 = vadd.f32 1.0, %v2956_v23  ;;  %v2970_v25 = vmul.f32 %v2969_v20, %v2955_v22 }
0x1d1f   : > { %3720 = vrcp.f32 %v2957_v24  ;;  %v2971_v28 = vmul.f32 1.442695, %v2970_v25 }
0x1d21   : > { %3722 = vpow2.f32 %v2971_v28 }
0x1d2c   : > { %v3721_v26 = vpop.eup %3720 }
0x1d2d   : > { %v2960_v27 = vmul.f32 1.0614054, %v3721_v26 }
0x1d2e   : > { %v3723_v39 = vpop.eup %3722 }
0x1d2f   : > { %v2961_v30 = vadd.f32 -1.4531521, %v2960_v27 }
0x1d31   : > { %v2962_v31 = vmul.f32 %v3721_v26, %v2961_v30 }
0x1d33   : > { %v2963_v32 = vadd.f32 1.4214138, %v2962_v31 }
0x1d35   : > { %v2964_v33 = vmul.f32 %v3721_v26, %v2963_v32 }
0x1d37   : > { %v2965_v35 = vadd.f32 -0.28449672, %v2964_v33 }
0x1d39   : > { %v2966_v37 = vmul.f32 %v3721_v26, %v2965_v35 }
0x1d3b   : > { %v2967_v38 = vadd.f32 0.2548296, %v2966_v37 }
0x1d3d   : > { %v2968_v36 = vmul.f32 %v3721_v26, %v2967_v38 }
0x1d3f   : > { %v2973_v40 = vmul.f32 %v3723_v39, %v2968_v36 }
0x1d41   : > { %v2974_v42 = vsub.f32 1.0, %v2973_v40 }
0x1d43   : > { %v2975_v43 = vmul.f32 %v2974_v42, %v2954_v41 }
0x1d45   : > { %v2976_v59 = vadd.f32 1.0, %v2975_v43 }
0x1d47   : > { %v2977_v45 = vmul.f32 %v2976_v59, %v2951_v44 }
0x1d49   : > { %v2978_v47 = vpack.c.bf16 %v2977_v45, %v2977_v45 }
0x1d4b   : > { %3562 = vmatmul.mubr.msk.bf16.vlgmr.msra.gmra.mxu0 %vm1978_vm9, %v2978_v47 }
0x1e0b   : > { %v3049_v2 = vpop.f32.mrf.mxu0 }
0x1e0c   : > { %v3050_v49 = vadd.f32 %v3049_v2, %v2987_v48 }
0x1e0d   : > { %v3563_v50 = vpop.f32.mrf.mxu0 }
0x1e0e   : > { %3056 = vst.msk [vmem:[%s726_s5] sm:$0x1] %vm3055_vm13, %v3050_v49 }
0x1e0f   : > { %v3052_v17 = vpop.f32.mrf.mxu0 }
0x1e11   : > { %v3564_v51 = vpop.f32.mrf.mxu0 }
0x1e12 PF: > { %s33_s4 = sadd.s32 1, %s3730_s4  }
0x1e13   : > { %p30_p4 = scmp.ge.s32.totalorder %s33_s4, 4  }
0x1e15   :  { %32 = sbr.rel (!%p30_p4) target bundleno = 9 (0x9), region = 156 }

</bundles_post_ra>
